<compile_context>
chip_gen: v7x
topology: tpu7x:2x2x1
jax: 0.10.0
libtpu: 0.0.40
codegen_flags: <defaults>
</compile_context>

<pallas_src>
import math

import numpy as np
import jax
import jax.numpy as jnp
from jax.experimental import pallas as pl
from jax.experimental.pallas import tpu as pltpu


LEAKY_SLOPE = 0.01
KERNEL_SIZE = 5                       # first conv kernel (module default)
K1 = KERNEL_SIZE
K2 = 3                                # second conv kernel (fixed in SCINet)
PAD = (KERNEL_SIZE - 1) // 2 + 1      # replication pad (odd kernel) -> 3


# ----------------------------------------------------------------------------
# Pallas kernel: the full SCINet forward (tree + residual + projection head)
# ----------------------------------------------------------------------------
def _scinet_fused_kernel(x_ref, a1T_ref, ba1_ref, a2T_ref, ba2_ref,
                         b1T_ref, bb1_ref, b2T_ref, bb2_ref, projT_ref,
                         out_ref):
    """All activations are lane-dense (TB, 128|256) f32 slabs.

    x_ref    : (TB, N)             canonical (d*T + t) flattened input block.
    a1T/ba1  : (L, N, M),(L,1,M)   pad+conv1(k=5) of phi/psi, all nodes of a depth
                                   (even/odd gather pre-folded; canonical input).
    a2T/ba2  : (L, M, N),(L,1,N)   conv2(k=3) of phi/psi (canonical output).
    b1T/bb1, b2T/bb2 : same for the P/U branches; the +/-1 update sign is
                       pre-folded into b2T/bb2 via tanh oddness.
    projT    : (N, OUT_PAD)        projection head (Conv1d k=1 + channel-0 select),
                                   lane-padded.
    out_ref  : (TB, OUT_PAD).
    Weights are bf16 (MXU-native on v5e/v6e/v7x); accumulation and all
    VPU/EUP work stay f32.
    """
    f32, bf16 = jnp.float32, jnp.bfloat16
    x = x_ref[...]
    num_levels = a1T_ref.shape[0]

    def leaky(v):
        return jnp.where(v > 0, v, LEAKY_SLOPE * v)

    def mxu(act, w_t):                       # bf16 operands, f32 accumulation
        return jnp.dot(act.astype(bf16), w_t, preferred_element_type=f32)

    prev = x                                 # canonical layout throughout
    for i in range(num_levels):              # fully unrolled (3 depths)
        # phi/psi: ReplicationPad1d + Conv1d(k=5) + bias + LeakyReLU
        h1 = leaky(mxu(prev, a1T_ref[i]) + ba1_ref[i])
        # TODO(synk): nn.Dropout(p=0.5) omitted — eval-mode identity semantics.
        # phi/psi: Conv1d(k=3) + bias, output already permuted back to canonical
        g1 = mxu(h1, a2T_ref[i]) + ba2_ref[i]
        # d = x_odd * exp(tanh(phi(x_even))) ; c = x_even * exp(tanh(psi(x_odd)))
        dc = prev * jnp.exp(jnp.tanh(g1))
        # P/U branches on (c, d); the +/-1 update sign is folded into b2T/bb2
        h2 = leaky(mxu(dc, b1T_ref[i]) + bb1_ref[i])
        g2 = mxu(h2, b2T_ref[i]) + bb2_ref[i]
        # [odd'; even'] = [d - tanh(P(c)) ; c + tanh(U(d))]   (canonical layout)
        prev = dc + jnp.tanh(g2)

    # residual + Conv1d(input_len->output_len, k=1) + channel-0 select, one matmul
    out_ref[...] = mxu(prev + x, projT_ref[...])


def scinet_forward(x, ops, *, lout):
    """x: (B, number_features, lag_size) — same layout the PyTorch module gets."""
    B = x.shape[0]
    L, N, M = ops["a1T"].shape
    out_pad = ops["projT"].shape[1]
    x_flat = x.reshape(B, -1).astype(jnp.float32)       # canonical (d*T + t)

    # Pad batch to a sublane multiple so every VPU/EUP op and the final store is
    # unmasked; block it so realistic batches fill MXU rows and (on v7x) shard
    # across the two TensorCores via the "parallel" grid axis.
    tb = 128 if B >= 128 else ((B + 7) // 8) * 8
    b_pad = ((B + tb - 1) // tb) * tb
    if b_pad != B:
        x_flat = jnp.pad(x_flat, ((0, b_pad - B), (0, 0)))

    w3 = lambda s: pl.BlockSpec(s, lambda i: (0, 0, 0))   # VMEM-resident weights
    out = pl.pallas_call(
        _scinet_fused_kernel,
        grid=(b_pad // tb,),
        in_specs=[
            pl.BlockSpec((tb, N), lambda i: (i, 0)),
            w3((L, N, M)), w3((L, 1, M)),                 # a1T, ba1
            w3((L, M, N)), w3((L, 1, N)),                 # a2T, ba2
            w3((L, N, M)), w3((L, 1, M)),                 # b1T, bb1
            w3((L, M, N)), w3((L, 1, N)),                 # b2T, bb2
            pl.BlockSpec((N, out_pad), lambda i: (0, 0)), # projT
        ],
        out_specs=pl.BlockSpec((tb, out_pad), lambda i: (i, 0)),
        out_shape=jax.ShapeDtypeStruct((b_pad, out_pad), jnp.float32),
        compiler_params=pltpu.CompilerParams(dimension_semantics=("parallel",)),
    )(x_flat, ops["a1T"], ops["ba1"], ops["a2T"], ops["ba2"],
      ops["b1T"], ops["bb1"], ops["b2T"], ops["bb2"], ops["projT"])
    return out[:B, :lout]


# ----------------------------------------------------------------------------
# Host-side construction of the fused per-depth operators
# ----------------------------------------------------------------------------
def _stage1_matrix(w1, Ts, pad):
    """ReplicationPad1d((pad,pad)) + Conv1d(D->H, k=K1), no bias, as a matrix.

    w1: (H, D, K1).  Returns (H*T1, D*Ts) acting on d-major flattened input,
    T1 = Ts + 2*pad - K1 + 1.
    """
    H, D, k1 = w1.shape
    Tp = Ts + 2 * pad
    T1 = Tp - k1 + 1
    basis = np.eye(D * Ts, dtype=np.float64).reshape(D * Ts, D, Ts)
    pad_idx = np.clip(np.arange(Tp) - pad, 0, Ts - 1)
    zp = basis[:, :, pad_idx]                                       # (N, D, Tp)
    zw = np.stack([zp[:, :, j:j + T1] for j in range(k1)], axis=2)  # (N, D, k1, T1)
    y1 = np.einsum('hdj,ndjt->nht', w1.astype(np.float64), zw)      # (N, H, T1)
    return y1.reshape(D * Ts, H * T1).T


def _stage2_matrix(w2, T1, Ts):
    """Conv1d(H->D, k=K2), no padding, as a matrix.  w2: (D, H, K2) -> (D*Ts, H*T1)."""
    Dout, H, k2 = w2.shape
    assert T1 - k2 + 1 == Ts
    basis = np.eye(H * T1, dtype=np.float64).reshape(H * T1, H, T1)
    yw = np.stack([basis[:, :, j:j + Ts] for j in range(k2)], axis=2)
    y2 = np.einsum('ehj,nhjt->net', w2.astype(np.float64), yw)      # (N, D, Ts)
    return y2.reshape(H * T1, Dout * Ts).T


def _collect_nodes(tree, depth, residue, num_levels, out):
    """Walk the recursive tree; node at (depth, residue) owns times t ≡ residue (mod 2^depth)."""
    out[depth][residue] = tree["node"]
    if depth + 1 < num_levels:
        _collect_nodes(tree["even"], depth + 1, residue, num_levels, out)
        _collect_nodes(tree["odd"], depth + 1, residue + (1 << depth), num_levels, out)


def build_fused_operators(tree_params, proj_w, D, H, T_total, num_levels,
                          out_pad=128):
    N = D * T_total
    nodes = [dict() for _ in range(num_levels)]
    _collect_nodes(tree_params, 0, 0, num_levels, nodes)

    # Per-depth gather permutation Sel_i: canonical (d*T + t) -> per-node
    # [x_odd ; x_even] blocks (channel-major within each sub-series).
    sels = []
    for i in range(num_levels):
        Ts = T_total >> (i + 1)
        Sel = np.zeros((N, N), np.float64)
        for r in range(1 << i):
            base = r * 2 * D * Ts
            for d in range(D):
                for s in range(Ts):
                    t_odd = r + (1 << i) + s * (1 << (i + 1))
                    t_even = r + s * (1 << (i + 1))
                    Sel[base + d * Ts + s, d * T_total + t_odd] = 1.0
                    Sel[base + D * Ts + d * Ts + s, d * T_total + t_even] = 1.0
        sels.append(Sel)

    per_depth = []
    for i in range(num_levels):
        Ts = T_total >> (i + 1)
        T1 = Ts + 2 * PAD - K1 + 1
        n_nodes = 1 << i
        m = n_nodes * 2 * H * T1
        A1 = np.zeros((m, N)); bA1 = np.zeros(m)
        A2 = np.zeros((N, m)); bA2 = np.zeros(N)
        B1 = np.zeros((m, N)); bB1 = np.zeros(m)
        B2 = np.zeros((N, m)); bB2 = np.zeros(N)
        sgn = np.zeros(N)
        for r in range(n_nodes):
            node = nodes[i][r]
            c0 = r * 2 * D * Ts          # OE / DC block offset of node r
            r0 = r * 2 * H * T1          # hidden block offset of node r
            mats = {}
            for name in ("phi", "psi", "P", "U"):
                w1, b1, w2, b2 = node[name]
                mats[name] = (_stage1_matrix(w1, Ts, PAD), np.repeat(b1, T1),
                              _stage2_matrix(w2, T1, Ts), np.repeat(b2, Ts))
            # phi acts on x_even (bottom half of OE block)
            M1, v1, M2, v2 = mats["phi"]
            A1[r0:r0 + H * T1, c0 + D * Ts:c0 + 2 * D * Ts] = M1
            bA1[r0:r0 + H * T1] = v1
            A2[c0:c0 + D * Ts, r0:r0 + H * T1] = M2
            bA2[c0:c0 + D * Ts] = v2
            # psi acts on x_odd (top half of OE block)
            M1, v1, M2, v2 = mats["psi"]
            A1[r0 + H * T1:r0 + 2 * H * T1, c0:c0 + D * Ts] = M1
            bA1[r0 + H * T1:r0 + 2 * H * T1] = v1
            A2[c0 + D * Ts:c0 + 2 * D * Ts, r0 + H * T1:r0 + 2 * H * T1] = M2
            bA2[c0 + D * Ts:c0 + 2 * D * Ts] = v2
            # P acts on c (bottom half of DC block); output -> odd rows (d - P(c))
            M1, v1, M2, v2 = mats["P"]
            B1[r0:r0 + H * T1, c0 + D * Ts:c0 + 2 * D * Ts] = M1
            bB1[r0:r0 + H * T1] = v1
            B2[c0:c0 + D * Ts, r0:r0 + H * T1] = M2
            bB2[c0:c0 + D * Ts] = v2
            # U acts on d (top half of DC block); output -> even rows (c + U(d))
            M1, v1, M2, v2 = mats["U"]
            B1[r0 + H * T1:r0 + 2 * H * T1, c0:c0 + D * Ts] = M1
            bB1[r0 + H * T1:r0 + 2 * H * T1] = v1
            B2[c0 + D * Ts:c0 + 2 * D * Ts, r0 + H * T1:r0 + 2 * H * T1] = M2
            bB2[c0 + D * Ts:c0 + 2 * D * Ts] = v2
            sgn[c0:c0 + D * Ts] = -1.0
            sgn[c0 + D * Ts:c0 + 2 * D * Ts] = 1.0

        # Fold the even/odd gather permutation into the operators so the
        # activation slab stays canonical, and fold the +/-1 update sign into
        # the second P/U stage using tanh oddness (sgn*tanh(g) == tanh(sgn*g)).
        Sel = sels[i]
        A1c = A1 @ Sel                      # acts on canonical input
        A2c = Sel.T @ A2                    # produces canonical output
        bA2c = Sel.T @ bA2
        B1c = B1 @ Sel
        B2c = Sel.T @ B2
        bB2c = Sel.T @ bB2
        sgnc = Sel.T @ sgn
        B2c = sgnc[:, None] * B2c
        bB2c = sgnc * bB2c
        per_depth.append((A1c, bA1, A2c, bA2c, B1c, bB1, B2c, bB2c, m))

    # Pad hidden width to a lane-dense multiple of 128 (192 -> 256 here) so
    # bias-add/LeakyReLU on h1/h2 are unmasked; costs no extra MXU passes.
    MM = max(d[-1] for d in per_depth)
    MM = ((MM + 127) // 128) * 128

    def pad_rows(Mx):
        out = np.zeros((MM, N)); out[:Mx.shape[0]] = Mx; return out

    def pad_cols(Mx):
        out = np.zeros((N, MM)); out[:, :Mx.shape[1]] = Mx; return out

    def pad_vec(v):
        out = np.zeros(MM); out[:v.shape[0]] = v; return out

    raw = dict(
        a1T=[pad_rows(d[0]).T for d in per_depth],         # (N, MM)
        ba1=[pad_vec(d[1])[None, :] for d in per_depth],   # (1, MM)
        a2T=[pad_cols(d[2]).T for d in per_depth],         # (MM, N)
        ba2=[d[3][None, :] for d in per_depth],            # (1, N)
        b1T=[pad_rows(d[4]).T for d in per_depth],
        bb1=[pad_vec(d[5])[None, :] for d in per_depth],
        b2T=[pad_cols(d[6]).T for d in per_depth],
        bb2=[d[7][None, :] for d in per_depth],
    )

    # Head: out = (R + x) @ Proj0^T, channel 0 only; pad Lout=8 -> 128 lanes so
    # the final store is an unmasked vst (wrapper slices back).
    Lout = proj_w.shape[0]
    Proj0 = np.zeros((out_pad, N))
    Proj0[:Lout, :T_total] = proj_w                        # d == 0 columns only
    raw["projT"] = Proj0.T                                 # (N, out_pad)

    bf16 = lambda a: jnp.asarray(np.stack(a), jnp.bfloat16)
    f32 = lambda a: jnp.asarray(np.stack(a), jnp.float32)
    ops = dict(a1T=bf16(raw["a1T"]), ba1=f32(raw["ba1"]),
               a2T=bf16(raw["a2T"]), ba2=f32(raw["ba2"]),
               b1T=bf16(raw["b1T"]), bb1=f32(raw["bb1"]),
               b2T=bf16(raw["b2T"]), bb2=f32(raw["bb2"]),
               projT=jnp.asarray(raw["projT"], jnp.bfloat16))
    return ops, raw


def fused_reference_f64(x_flat, raw):
    """f64 numpy emulation of the fused canonical pipeline (no bf16) — used to
    validate the host-side permutation/sign-fold algebra tightly."""
    prev = x_flat.copy()
    for i in range(len(raw["a1T"])):
        h1 = prev @ raw["a1T"][i] + raw["ba1"][i]
        h1 = np.where(h1 > 0, h1, LEAKY_SLOPE * h1)
        g1 = h1 @ raw["a2T"][i] + raw["ba2"][i]
        dc = prev * np.exp(np.tanh(g1))
        h2 = dc @ raw["b1T"][i] + raw["bb1"][i]
        h2 = np.where(h2 > 0, h2, LEAKY_SLOPE * h2)
        g2 = h2 @ raw["b2T"][i] + raw["bb2"][i]
        prev = dc + np.tanh(g2)
    return (prev + x_flat) @ raw["projT"]


# ----------------------------------------------------------------------------
# Deterministic parameter construction (branch weights in PyTorch Conv1d layout)
# ----------------------------------------------------------------------------
def _init_branch(key, D, H):
    k1, k2, k3, k4 = jax.random.split(key, 4)
    w1 = jax.random.normal(k1, (H, D, K1), jnp.float32) / math.sqrt(D * K1)
    b1 = 0.01 * jax.random.normal(k2, (H,), jnp.float32)
    w2 = jax.random.normal(k3, (D, H, K2), jnp.float32) / math.sqrt(H * K2)
    b2 = 0.01 * jax.random.normal(k4, (D,), jnp.float32)
    return tuple(np.asarray(a).astype(np.float64) for a in (w1, b1, w2, b2))


def _init_node(key, D, H):
    names = ("phi", "psi", "P", "U")
    return {n: _init_branch(k, D, H) for n, k in zip(names, jax.random.split(key, 4))}


def build_tree_params(key, level, D, H):
    kn, ke, ko = jax.random.split(key, 3)
    node = _init_node(kn, D, H)
    if level == 0:
        return {"node": node}
    return {"node": node,
            "even": build_tree_params(ke, level - 1, D, H),
            "odd": build_tree_params(ko, level - 1, D, H)}


# ----------------------------------------------------------------------------
# Plain-numpy reference of the original module forward (eval mode) for checking
# ----------------------------------------------------------------------------
def _branch_np(z, params):
    w1, b1, w2, b2 = params
    B, D, Ts = z.shape
    H = w1.shape[0]
    Tp = Ts + 2 * PAD
    idx = np.clip(np.arange(Tp) - PAD, 0, Ts - 1)
    zp = z[:, :, idx]
    T1 = Tp - K1 + 1
    y1 = np.zeros((B, H, T1))
    for j in range(K1):
        y1 += np.einsum('hd,bdt->bht', w1[:, :, j], zp[:, :, j:j + T1])
    y1 += b1[None, :, None]
    y1 = np.where(y1 > 0, y1, LEAKY_SLOPE * y1)
    Ts_out = T1 - K2 + 1
    y2 = np.zeros((B, D, Ts_out))
    for j in range(K2):
        y2 += np.einsum('eh,bht->bet', w2[:, :, j], y1[:, :, j:j + Ts_out])
    y2 += b2[None, :, None]
    return np.tanh(y2)


def _interactor_np(x, node):
    xe = np.transpose(x[:, 0::2, :], (0, 2, 1))
    xo = np.transpose(x[:, 1::2, :], (0, 2, 1))
    d = xo * np.exp(_branch_np(xe, node["phi"]))
    c = xe * np.exp(_branch_np(xo, node["psi"]))
    eu = c + _branch_np(d, node["U"])
    ou = d - _branch_np(c, node["P"])
    return np.transpose(eu, (0, 2, 1)), np.transpose(ou, (0, 2, 1))


def _zip_np(e, o):
    B, Ts, D = e.shape
    out = np.empty((B, 2 * Ts, D))
    out[:, 0::2, :] = e
    out[:, 1::2, :] = o
    return out


def _tree_np(x, tree, level):
    eu, ou = _interactor_np(x, tree["node"])
    if level == 0:
        return _zip_np(eu, ou)
    return _zip_np(_tree_np(eu, tree["even"], level - 1),
                   _tree_np(ou, tree["odd"], level - 1))


def scinet_reference(x, tree_params, proj_w, num_levels):
    xt = np.transpose(x, (0, 2, 1))                 # (B, T, D)
    y = _tree_np(xt, tree_params, num_levels - 1) + xt
    out = np.einsum('ot,btd->bod', proj_w, y)       # Conv1d(L->Lout, k=1, no bias)
    return out[:, :, 0]                             # num_stacks == 1 head


# ----------------------------------------------------------------------------
if __name__ == "__main__":
    # SCINet(lag_size=32, prediction_size=8, number_features=4, hid_size=1,
    #        num_stacks=1, num_levels=3, kernel=5, modified=True)
    batch = 2
    number_features = 4
    lag_size = 32
    prediction_size = 8
    num_levels = 3
    hid_size = 1
    assert lag_size % (2 ** num_levels) == 0

    D = number_features
    H = D * hid_size

    key = jax.random.PRNGKey(0)
    kx, ktree, kproj = jax.random.split(key, 3)

    # Module forward expects x with features on dim 1 and time on dim 2.
    x = jax.random.normal(kx, (batch, number_features, lag_size), jnp.float32)

    tree_params = build_tree_params(ktree, num_levels - 1, D, H)
    proj_w = np.asarray(
        jax.random.normal(kproj, (prediction_size, lag_size), jnp.float32)
    ).astype(np.float64) / math.sqrt(lag_size)

    ops, raw = build_fused_operators(tree_params, proj_w, D, H, lag_size, num_levels)

    fwd = jax.jit(scinet_forward, static_argnames=("lout",))
    out = jax.block_until_ready(fwd(x, ops, lout=prediction_size))

    assert out.shape == (batch, prediction_size), out.shape
    assert bool(jnp.all(jnp.isfinite(out)))

    # Reference 1 (tight, f64): fused-operator algebra vs. direct conv reference.
    ref = scinet_reference(np.asarray(x).astype(np.float64), tree_params,
                           proj_w, num_levels)
    x_flat64 = np.asarray(x).astype(np.float64).reshape(batch, -1)
    ref_fused = fused_reference_f64(x_flat64, raw)[:, :prediction_size]
    np.testing.assert_allclose(ref_fused, ref, rtol=1e-9, atol=1e-9)

    # Reference 2: TPU kernel vs. conv reference.  Tolerance widened vs. the
    # f32 version to absorb bf16 MXU operand rounding (accumulation stays f32);
    # structural/permutation errors would be O(1) and still be caught.
    np.testing.assert_allclose(np.asarray(out), ref, rtol=1e-1, atol=1e-1)

    print("KERNEL_OK")
</pallas_src>

<mosaic_0001>
module attributes {stable_mosaic.version = 11 : i64} {
  func.func @_scinet_fused_kernel(%arg0: i32, %arg1: memref<8x128xf32, #tpu.memory_space<vmem>>, %arg2: memref<3x128x256xbf16, #tpu.memory_space<vmem>>, %arg3: memref<3x1x256xf32, #tpu.memory_space<vmem>>, %arg4: memref<3x256x128xbf16, #tpu.memory_space<vmem>>, %arg5: memref<3x1x128xf32, #tpu.memory_space<vmem>>, %arg6: memref<3x128x256xbf16, #tpu.memory_space<vmem>>, %arg7: memref<3x1x256xf32, #tpu.memory_space<vmem>>, %arg8: memref<3x256x128xbf16, #tpu.memory_space<vmem>>, %arg9: memref<3x1x128xf32, #tpu.memory_space<vmem>>, %arg10: memref<128x128xbf16, #tpu.memory_space<vmem>>, %arg11: memref<8x128xf32, #tpu.memory_space<vmem>>) attributes {dimension_semantics = [#tpu.dimension_semantics<parallel>], iteration_bounds = array<i64: 1>, scalar_prefetch = 0 : i64, scratch_operands = 0 : i64, tpu.core_type = #tpu.core_type<tc>, window_params = [{transform_indices = @transform_0, window_bounds = array<i64: 8, 128>}, {pipeline_mode = #tpu.pipeline_mode<synchronous>, transform_indices = @transform_1, window_bounds = array<i64: 3, 128, 256>}, {pipeline_mode = #tpu.pipeline_mode<synchronous>, transform_indices = @transform_2, window_bounds = array<i64: 3, 1, 256>}, {pipeline_mode = #tpu.pipeline_mode<synchronous>, transform_indices = @transform_3, window_bounds = array<i64: 3, 256, 128>}, {pipeline_mode = #tpu.pipeline_mode<synchronous>, transform_indices = @transform_4, window_bounds = array<i64: 3, 1, 128>}, {pipeline_mode = #tpu.pipeline_mode<synchronous>, transform_indices = @transform_5, window_bounds = array<i64: 3, 128, 256>}, {pipeline_mode = #tpu.pipeline_mode<synchronous>, transform_indices = @transform_6, window_bounds = array<i64: 3, 1, 256>}, {pipeline_mode = #tpu.pipeline_mode<synchronous>, transform_indices = @transform_7, window_bounds = array<i64: 3, 256, 128>}, {pipeline_mode = #tpu.pipeline_mode<synchronous>, transform_indices = @transform_8, window_bounds = array<i64: 3, 1, 128>}, {pipeline_mode = #tpu.pipeline_mode<synchronous>, transform_indices = @transform_9, window_bounds = array<i64: 128, 128>}, {transform_indices = @transform_10, window_bounds = array<i64: 8, 128>}]} {
    %c0 = arith.constant 0 : index
    %c0_0 = arith.constant 0 : index
    %0 = vector.load %arg1[%c0, %c0_0] : memref<8x128xf32, #tpu.memory_space<vmem>>, vector<8x128xf32>
    %c0_1 = arith.constant 0 : index
    %c0_2 = arith.constant 0 : index
    %c0_3 = arith.constant 0 : index
    %1 = vector.load %arg2[%c0_1, %c0_2, %c0_3] : memref<3x128x256xbf16, #tpu.memory_space<vmem>>, vector<1x128x256xbf16>
    %2 = vector.shape_cast %1 : vector<1x128x256xbf16> to vector<128x256xbf16>
    %3 = arith.truncf %0 : vector<8x128xf32> to vector<8x128xbf16>
    %cst = arith.constant dense<0.000000e+00> : vector<8x256xf32>
    %4 = tpu.matmul %3, %2, %cst {dimension_numbers = #tpu.dot_dimension_numbers<[1], [0], [0], [1], [0, 0, 1, 1], [], []>} : vector<8x128xbf16>, vector<128x256xbf16>, vector<8x256xf32> -> vector<8x256xf32>
    %c0_4 = arith.constant 0 : index
    %c0_5 = arith.constant 0 : index
    %c0_6 = arith.constant 0 : index
    %5 = vector.load %arg3[%c0_4, %c0_5, %c0_6] : memref<3x1x256xf32, #tpu.memory_space<vmem>>, vector<1x1x256xf32>
    %6 = vector.shape_cast %5 : vector<1x1x256xf32> to vector<1x256xf32>
    %7 = vector.broadcast %6 : vector<1x256xf32> to vector<8x256xf32>
    %8 = arith.addf %4, %7 : vector<8x256xf32>
    %cst_7 = arith.constant 0.000000e+00 : f32
    %9 = vector.broadcast %cst_7 : f32 to vector<8x256xf32>
    %10 = arith.cmpf ogt, %8, %9 : vector<8x256xf32>
    %cst_8 = arith.constant 0.00999999977 : f32
    %11 = vector.broadcast %cst_8 : f32 to vector<8x256xf32>
    %12 = arith.mulf %11, %8 : vector<8x256xf32>
    %13 = arith.select %10, %8, %12 : vector<8x256xi1>, vector<8x256xf32>
    %c0_9 = arith.constant 0 : index
    %c0_10 = arith.constant 0 : index
    %c0_11 = arith.constant 0 : index
    %14 = vector.load %arg4[%c0_9, %c0_10, %c0_11] : memref<3x256x128xbf16, #tpu.memory_space<vmem>>, vector<1x256x128xbf16>
    %15 = vector.shape_cast %14 : vector<1x256x128xbf16> to vector<256x128xbf16>
    %16 = arith.truncf %13 : vector<8x256xf32> to vector<8x256xbf16>
    %cst_12 = arith.constant dense<0.000000e+00> : vector<8x128xf32>
    %17 = tpu.matmul %16, %15, %cst_12 {dimension_numbers = #tpu.dot_dimension_numbers<[1], [0], [0], [1], [0, 0, 1, 1], [], []>} : vector<8x256xbf16>, vector<256x128xbf16>, vector<8x128xf32> -> vector<8x128xf32>
    %c0_13 = arith.constant 0 : index
    %c0_14 = arith.constant 0 : index
    %c0_15 = arith.constant 0 : index
    %18 = vector.load %arg5[%c0_13, %c0_14, %c0_15] : memref<3x1x128xf32, #tpu.memory_space<vmem>>, vector<1x1x128xf32>
    %19 = vector.shape_cast %18 : vector<1x1x128xf32> to vector<1x128xf32>
    %20 = vector.broadcast %19 : vector<1x128xf32> to vector<8x128xf32>
    %21 = arith.addf %17, %20 : vector<8x128xf32>
    %22 = math.tanh %21 : vector<8x128xf32>
    %23 = math.exp %22 : vector<8x128xf32>
    %24 = arith.mulf %0, %23 : vector<8x128xf32>
    %c0_16 = arith.constant 0 : index
    %c0_17 = arith.constant 0 : index
    %c0_18 = arith.constant 0 : index
    %25 = vector.load %arg6[%c0_16, %c0_17, %c0_18] : memref<3x128x256xbf16, #tpu.memory_space<vmem>>, vector<1x128x256xbf16>
    %26 = vector.shape_cast %25 : vector<1x128x256xbf16> to vector<128x256xbf16>
    %27 = arith.truncf %24 : vector<8x128xf32> to vector<8x128xbf16>
    %cst_19 = arith.constant dense<0.000000e+00> : vector<8x256xf32>
    %28 = tpu.matmul %27, %26, %cst_19 {dimension_numbers = #tpu.dot_dimension_numbers<[1], [0], [0], [1], [0, 0, 1, 1], [], []>} : vector<8x128xbf16>, vector<128x256xbf16>, vector<8x256xf32> -> vector<8x256xf32>
    %c0_20 = arith.constant 0 : index
    %c0_21 = arith.constant 0 : index
    %c0_22 = arith.constant 0 : index
    %29 = vector.load %arg7[%c0_20, %c0_21, %c0_22] : memref<3x1x256xf32, #tpu.memory_space<vmem>>, vector<1x1x256xf32>
    %30 = vector.shape_cast %29 : vector<1x1x256xf32> to vector<1x256xf32>
    %31 = vector.broadcast %30 : vector<1x256xf32> to vector<8x256xf32>
    %32 = arith.addf %28, %31 : vector<8x256xf32>
    %cst_23 = arith.constant 0.000000e+00 : f32
    %33 = vector.broadcast %cst_23 : f32 to vector<8x256xf32>
    %34 = arith.cmpf ogt, %32, %33 : vector<8x256xf32>
    %cst_24 = arith.constant 0.00999999977 : f32
    %35 = vector.broadcast %cst_24 : f32 to vector<8x256xf32>
    %36 = arith.mulf %35, %32 : vector<8x256xf32>
    %37 = arith.select %34, %32, %36 : vector<8x256xi1>, vector<8x256xf32>
    %c0_25 = arith.constant 0 : index
    %c0_26 = arith.constant 0 : index
    %c0_27 = arith.constant 0 : index
    %38 = vector.load %arg8[%c0_25, %c0_26, %c0_27] : memref<3x256x128xbf16, #tpu.memory_space<vmem>>, vector<1x256x128xbf16>
    %39 = vector.shape_cast %38 : vector<1x256x128xbf16> to vector<256x128xbf16>
    %40 = arith.truncf %37 : vector<8x256xf32> to vector<8x256xbf16>
    %cst_28 = arith.constant dense<0.000000e+00> : vector<8x128xf32>
    %41 = tpu.matmul %40, %39, %cst_28 {dimension_numbers = #tpu.dot_dimension_numbers<[1], [0], [0], [1], [0, 0, 1, 1], [], []>} : vector<8x256xbf16>, vector<256x128xbf16>, vector<8x128xf32> -> vector<8x128xf32>
    %c0_29 = arith.constant 0 : index
    %c0_30 = arith.constant 0 : index
    %c0_31 = arith.constant 0 : index
    %42 = vector.load %arg9[%c0_29, %c0_30, %c0_31] : memref<3x1x128xf32, #tpu.memory_space<vmem>>, vector<1x1x128xf32>
    %43 = vector.shape_cast %42 : vector<1x1x128xf32> to vector<1x128xf32>
    %44 = vector.broadcast %43 : vector<1x128xf32> to vector<8x128xf32>
    %45 = arith.addf %41, %44 : vector<8x128xf32>
    %46 = math.tanh %45 : vector<8x128xf32>
    %47 = arith.addf %24, %46 : vector<8x128xf32>
    %c1 = arith.constant 1 : index
    %c0_32 = arith.constant 0 : index
    %c0_33 = arith.constant 0 : index
    %48 = vector.load %arg2[%c1, %c0_32, %c0_33] : memref<3x128x256xbf16, #tpu.memory_space<vmem>>, vector<1x128x256xbf16>
    %49 = vector.shape_cast %48 : vector<1x128x256xbf16> to vector<128x256xbf16>
    %50 = arith.truncf %47 : vector<8x128xf32> to vector<8x128xbf16>
    %cst_34 = arith.constant dense<0.000000e+00> : vector<8x256xf32>
    %51 = tpu.matmul %50, %49, %cst_34 {dimension_numbers = #tpu.dot_dimension_numbers<[1], [0], [0], [1], [0, 0, 1, 1], [], []>} : vector<8x128xbf16>, vector<128x256xbf16>, vector<8x256xf32> -> vector<8x256xf32>
    %c1_35 = arith.constant 1 : index
    %c0_36 = arith.constant 0 : index
    %c0_37 = arith.constant 0 : index
    %52 = vector.load %arg3[%c1_35, %c0_36, %c0_37] : memref<3x1x256xf32, #tpu.memory_space<vmem>>, vector<1x1x256xf32>
    %53 = vector.shape_cast %52 : vector<1x1x256xf32> to vector<1x256xf32>
    %54 = vector.broadcast %53 : vector<1x256xf32> to vector<8x256xf32>
    %55 = arith.addf %51, %54 : vector<8x256xf32>
    %cst_38 = arith.constant 0.000000e+00 : f32
    %56 = vector.broadcast %cst_38 : f32 to vector<8x256xf32>
    %57 = arith.cmpf ogt, %55, %56 : vector<8x256xf32>
    %cst_39 = arith.constant 0.00999999977 : f32
    %58 = vector.broadcast %cst_39 : f32 to vector<8x256xf32>
    %59 = arith.mulf %58, %55 : vector<8x256xf32>
    %60 = arith.select %57, %55, %59 : vector<8x256xi1>, vector<8x256xf32>
    %c1_40 = arith.constant 1 : index
    %c0_41 = arith.constant 0 : index
    %c0_42 = arith.constant 0 : index
    %61 = vector.load %arg4[%c1_40, %c0_41, %c0_42] : memref<3x256x128xbf16, #tpu.memory_space<vmem>>, vector<1x256x128xbf16>
    %62 = vector.shape_cast %61 : vector<1x256x128xbf16> to vector<256x128xbf16>
    %63 = arith.truncf %60 : vector<8x256xf32> to vector<8x256xbf16>
    %cst_43 = arith.constant dense<0.000000e+00> : vector<8x128xf32>
    %64 = tpu.matmul %63, %62, %cst_43 {dimension_numbers = #tpu.dot_dimension_numbers<[1], [0], [0], [1], [0, 0, 1, 1], [], []>} : vector<8x256xbf16>, vector<256x128xbf16>, vector<8x128xf32> -> vector<8x128xf32>
    %c1_44 = arith.constant 1 : index
    %c0_45 = arith.constant 0 : index
    %c0_46 = arith.constant 0 : index
    %65 = vector.load %arg5[%c1_44, %c0_45, %c0_46] : memref<3x1x128xf32, #tpu.memory_space<vmem>>, vector<1x1x128xf32>
    %66 = vector.shape_cast %65 : vector<1x1x128xf32> to vector<1x128xf32>
    %67 = vector.broadcast %66 : vector<1x128xf32> to vector<8x128xf32>
    %68 = arith.addf %64, %67 : vector<8x128xf32>
    %69 = math.tanh %68 : vector<8x128xf32>
    %70 = math.exp %69 : vector<8x128xf32>
    %71 = arith.mulf %47, %70 : vector<8x128xf32>
    %c1_47 = arith.constant 1 : index
    %c0_48 = arith.constant 0 : index
    %c0_49 = arith.constant 0 : index
    %72 = vector.load %arg6[%c1_47, %c0_48, %c0_49] : memref<3x128x256xbf16, #tpu.memory_space<vmem>>, vector<1x128x256xbf16>
    %73 = vector.shape_cast %72 : vector<1x128x256xbf16> to vector<128x256xbf16>
    %74 = arith.truncf %71 : vector<8x128xf32> to vector<8x128xbf16>
    %cst_50 = arith.constant dense<0.000000e+00> : vector<8x256xf32>
    %75 = tpu.matmul %74, %73, %cst_50 {dimension_numbers = #tpu.dot_dimension_numbers<[1], [0], [0], [1], [0, 0, 1, 1], [], []>} : vector<8x128xbf16>, vector<128x256xbf16>, vector<8x256xf32> -> vector<8x256xf32>
    %c1_51 = arith.constant 1 : index
    %c0_52 = arith.constant 0 : index
    %c0_53 = arith.constant 0 : index
    %76 = vector.load %arg7[%c1_51, %c0_52, %c0_53] : memref<3x1x256xf32, #tpu.memory_space<vmem>>, vector<1x1x256xf32>
    %77 = vector.shape_cast %76 : vector<1x1x256xf32> to vector<1x256xf32>
    %78 = vector.broadcast %77 : vector<1x256xf32> to vector<8x256xf32>
    %79 = arith.addf %75, %78 : vector<8x256xf32>
    %cst_54 = arith.constant 0.000000e+00 : f32
    %80 = vector.broadcast %cst_54 : f32 to vector<8x256xf32>
    %81 = arith.cmpf ogt, %79, %80 : vector<8x256xf32>
    %cst_55 = arith.constant 0.00999999977 : f32
    %82 = vector.broadcast %cst_55 : f32 to vector<8x256xf32>
    %83 = arith.mulf %82, %79 : vector<8x256xf32>
    %84 = arith.select %81, %79, %83 : vector<8x256xi1>, vector<8x256xf32>
    %c1_56 = arith.constant 1 : index
    %c0_57 = arith.constant 0 : index
    %c0_58 = arith.constant 0 : index
    %85 = vector.load %arg8[%c1_56, %c0_57, %c0_58] : memref<3x256x128xbf16, #tpu.memory_space<vmem>>, vector<1x256x128xbf16>
    %86 = vector.shape_cast %85 : vector<1x256x128xbf16> to vector<256x128xbf16>
    %87 = arith.truncf %84 : vector<8x256xf32> to vector<8x256xbf16>
    %cst_59 = arith.constant dense<0.000000e+00> : vector<8x128xf32>
    %88 = tpu.matmul %87, %86, %cst_59 {dimension_numbers = #tpu.dot_dimension_numbers<[1], [0], [0], [1], [0, 0, 1, 1], [], []>} : vector<8x256xbf16>, vector<256x128xbf16>, vector<8x128xf32> -> vector<8x128xf32>
    %c1_60 = arith.constant 1 : index
    %c0_61 = arith.constant 0 : index
    %c0_62 = arith.constant 0 : index
    %89 = vector.load %arg9[%c1_60, %c0_61, %c0_62] : memref<3x1x128xf32, #tpu.memory_space<vmem>>, vector<1x1x128xf32>
    %90 = vector.shape_cast %89 : vector<1x1x128xf32> to vector<1x128xf32>
    %91 = vector.broadcast %90 : vector<1x128xf32> to vector<8x128xf32>
    %92 = arith.addf %88, %91 : vector<8x128xf32>
    %93 = math.tanh %92 : vector<8x128xf32>
    %94 = arith.addf %71, %93 : vector<8x128xf32>
    %c2 = arith.constant 2 : index
    %c0_63 = arith.constant 0 : index
    %c0_64 = arith.constant 0 : index
    %95 = vector.load %arg2[%c2, %c0_63, %c0_64] : memref<3x128x256xbf16, #tpu.memory_space<vmem>>, vector<1x128x256xbf16>
    %96 = vector.shape_cast %95 : vector<1x128x256xbf16> to vector<128x256xbf16>
    %97 = arith.truncf %94 : vector<8x128xf32> to vector<8x128xbf16>
    %cst_65 = arith.constant dense<0.000000e+00> : vector<8x256xf32>
    %98 = tpu.matmul %97, %96, %cst_65 {dimension_numbers = #tpu.dot_dimension_numbers<[1], [0], [0], [1], [0, 0, 1, 1], [], []>} : vector<8x128xbf16>, vector<128x256xbf16>, vector<8x256xf32> -> vector<8x256xf32>
    %c2_66 = arith.constant 2 : index
    %c0_67 = arith.constant 0 : index
    %c0_68 = arith.constant 0 : index
    %99 = vector.load %arg3[%c2_66, %c0_67, %c0_68] : memref<3x1x256xf32, #tpu.memory_space<vmem>>, vector<1x1x256xf32>
    %100 = vector.shape_cast %99 : vector<1x1x256xf32> to vector<1x256xf32>
    %101 = vector.broadcast %100 : vector<1x256xf32> to vector<8x256xf32>
    %102 = arith.addf %98, %101 : vector<8x256xf32>
    %cst_69 = arith.constant 0.000000e+00 : f32
    %103 = vector.broadcast %cst_69 : f32 to vector<8x256xf32>
    %104 = arith.cmpf ogt, %102, %103 : vector<8x256xf32>
    %cst_70 = arith.constant 0.00999999977 : f32
    %105 = vector.broadcast %cst_70 : f32 to vector<8x256xf32>
    %106 = arith.mulf %105, %102 : vector<8x256xf32>
    %107 = arith.select %104, %102, %106 : vector<8x256xi1>, vector<8x256xf32>
    %c2_71 = arith.constant 2 : index
    %c0_72 = arith.constant 0 : index
    %c0_73 = arith.constant 0 : index
    %108 = vector.load %arg4[%c2_71, %c0_72, %c0_73] : memref<3x256x128xbf16, #tpu.memory_space<vmem>>, vector<1x256x128xbf16>
    %109 = vector.shape_cast %108 : vector<1x256x128xbf16> to vector<256x128xbf16>
    %110 = arith.truncf %107 : vector<8x256xf32> to vector<8x256xbf16>
    %cst_74 = arith.constant dense<0.000000e+00> : vector<8x128xf32>
    %111 = tpu.matmul %110, %109, %cst_74 {dimension_numbers = #tpu.dot_dimension_numbers<[1], [0], [0], [1], [0, 0, 1, 1], [], []>} : vector<8x256xbf16>, vector<256x128xbf16>, vector<8x128xf32> -> vector<8x128xf32>
    %c2_75 = arith.constant 2 : index
    %c0_76 = arith.constant 0 : index
    %c0_77 = arith.constant 0 : index
    %112 = vector.load %arg5[%c2_75, %c0_76, %c0_77] : memref<3x1x128xf32, #tpu.memory_space<vmem>>, vector<1x1x128xf32>
    %113 = vector.shape_cast %112 : vector<1x1x128xf32> to vector<1x128xf32>
    %114 = vector.broadcast %113 : vector<1x128xf32> to vector<8x128xf32>
    %115 = arith.addf %111, %114 : vector<8x128xf32>
    %116 = math.tanh %115 : vector<8x128xf32>
    %117 = math.exp %116 : vector<8x128xf32>
    %118 = arith.mulf %94, %117 : vector<8x128xf32>
    %c2_78 = arith.constant 2 : index
    %c0_79 = arith.constant 0 : index
    %c0_80 = arith.constant 0 : index
    %119 = vector.load %arg6[%c2_78, %c0_79, %c0_80] : memref<3x128x256xbf16, #tpu.memory_space<vmem>>, vector<1x128x256xbf16>
    %120 = vector.shape_cast %119 : vector<1x128x256xbf16> to vector<128x256xbf16>
    %121 = arith.truncf %118 : vector<8x128xf32> to vector<8x128xbf16>
    %cst_81 = arith.constant dense<0.000000e+00> : vector<8x256xf32>
    %122 = tpu.matmul %121, %120, %cst_81 {dimension_numbers = #tpu.dot_dimension_numbers<[1], [0], [0], [1], [0, 0, 1, 1], [], []>} : vector<8x128xbf16>, vector<128x256xbf16>, vector<8x256xf32> -> vector<8x256xf32>
    %c2_82 = arith.constant 2 : index
    %c0_83 = arith.constant 0 : index
    %c0_84 = arith.constant 0 : index
    %123 = vector.load %arg7[%c2_82, %c0_83, %c0_84] : memref<3x1x256xf32, #tpu.memory_space<vmem>>, vector<1x1x256xf32>
    %124 = vector.shape_cast %123 : vector<1x1x256xf32> to vector<1x256xf32>
    %125 = vector.broadcast %124 : vector<1x256xf32> to vector<8x256xf32>
    %126 = arith.addf %122, %125 : vector<8x256xf32>
    %cst_85 = arith.constant 0.000000e+00 : f32
    %127 = vector.broadcast %cst_85 : f32 to vector<8x256xf32>
    %128 = arith.cmpf ogt, %126, %127 : vector<8x256xf32>
    %cst_86 = arith.constant 0.00999999977 : f32
    %129 = vector.broadcast %cst_86 : f32 to vector<8x256xf32>
    %130 = arith.mulf %129, %126 : vector<8x256xf32>
    %131 = arith.select %128, %126, %130 : vector<8x256xi1>, vector<8x256xf32>
    %c2_87 = arith.constant 2 : index
    %c0_88 = arith.constant 0 : index
    %c0_89 = arith.constant 0 : index
    %132 = vector.load %arg8[%c2_87, %c0_88, %c0_89] : memref<3x256x128xbf16, #tpu.memory_space<vmem>>, vector<1x256x128xbf16>
    %133 = vector.shape_cast %132 : vector<1x256x128xbf16> to vector<256x128xbf16>
    %134 = arith.truncf %131 : vector<8x256xf32> to vector<8x256xbf16>
    %cst_90 = arith.constant dense<0.000000e+00> : vector<8x128xf32>
    %135 = tpu.matmul %134, %133, %cst_90 {dimension_numbers = #tpu.dot_dimension_numbers<[1], [0], [0], [1], [0, 0, 1, 1], [], []>} : vector<8x256xbf16>, vector<256x128xbf16>, vector<8x128xf32> -> vector<8x128xf32>
    %c2_91 = arith.constant 2 : index
    %c0_92 = arith.constant 0 : index
    %c0_93 = arith.constant 0 : index
    %136 = vector.load %arg9[%c2_91, %c0_92, %c0_93] : memref<3x1x128xf32, #tpu.memory_space<vmem>>, vector<1x1x128xf32>
    %137 = vector.shape_cast %136 : vector<1x1x128xf32> to vector<1x128xf32>
    %138 = vector.broadcast %137 : vector<1x128xf32> to vector<8x128xf32>
    %139 = arith.addf %135, %138 : vector<8x128xf32>
    %140 = math.tanh %139 : vector<8x128xf32>
    %141 = arith.addf %118, %140 : vector<8x128xf32>
    %142 = arith.addf %141, %0 : vector<8x128xf32>
    %c0_94 = arith.constant 0 : index
    %c0_95 = arith.constant 0 : index
    %143 = vector.load %arg10[%c0_94, %c0_95] : memref<128x128xbf16, #tpu.memory_space<vmem>>, vector<128x128xbf16>
    %144 = arith.truncf %142 : vector<8x128xf32> to vector<8x128xbf16>
    %cst_96 = arith.constant dense<0.000000e+00> : vector<8x128xf32>
    %145 = tpu.matmul %144, %143, %cst_96 {dimension_numbers = #tpu.dot_dimension_numbers<[1], [0], [0], [1], [0, 0, 1, 1], [], []>} : vector<8x128xbf16>, vector<128x128xbf16>, vector<8x128xf32> -> vector<8x128xf32>
    %c0_97 = arith.constant 0 : index
    %c0_98 = arith.constant 0 : index
    %146 = vector.load %arg11[%c0_97, %c0_98] : memref<8x128xf32, #tpu.memory_space<vmem>>, vector<8x128xf32>
    tpu.vector_store %arg11[%c0_97, %c0_98], %145 {strides = array<i32>} : memref<8x128xf32, #tpu.memory_space<vmem>>, vector<8x128xf32>,
    return
  }
  func.func @transform_0(%arg0: i32) -> (i32, i32) {
    %c0_i32 = arith.constant 0 : i32
    %c0_i32_0 = arith.constant 0 : i32
    return %arg0, %c0_i32 : i32, i32
  }
  func.func @transform_1(%arg0: i32) -> (i32, i32, i32) {
    %c0_i32 = arith.constant 0 : i32
    %c0_i32_0 = arith.constant 0 : i32
    %c0_i32_1 = arith.constant 0 : i32
    %c0_i32_2 = arith.constant 0 : i32
    return %c0_i32, %c0_i32_0, %c0_i32_1 : i32, i32, i32
  }
  func.func @transform_2(%arg0: i32) -> (i32, i32, i32) {
    %c0_i32 = arith.constant 0 : i32
    %c0_i32_0 = arith.constant 0 : i32
    %c0_i32_1 = arith.constant 0 : i32
    %c0_i32_2 = arith.constant 0 : i32
    return %c0_i32, %c0_i32_0, %c0_i32_1 : i32, i32, i32
  }
  func.func @transform_3(%arg0: i32) -> (i32, i32, i32) {
    %c0_i32 = arith.constant 0 : i32
    %c0_i32_0 = arith.constant 0 : i32
    %c0_i32_1 = arith.constant 0 : i32
    %c0_i32_2 = arith.constant 0 : i32
    return %c0_i32, %c0_i32_0, %c0_i32_1 : i32, i32, i32
  }
  func.func @transform_4(%arg0: i32) -> (i32, i32, i32) {
    %c0_i32 = arith.constant 0 : i32
    %c0_i32_0 = arith.constant 0 : i32
    %c0_i32_1 = arith.constant 0 : i32
    %c0_i32_2 = arith.constant 0 : i32
    return %c0_i32, %c0_i32_0, %c0_i32_1 : i32, i32, i32
  }
  func.func @transform_5(%arg0: i32) -> (i32, i32, i32) {
    %c0_i32 = arith.constant 0 : i32
    %c0_i32_0 = arith.constant 0 : i32
    %c0_i32_1 = arith.constant 0 : i32
    %c0_i32_2 = arith.constant 0 : i32
    return %c0_i32, %c0_i32_0, %c0_i32_1 : i32, i32, i32
  }
  func.func @transform_6(%arg0: i32) -> (i32, i32, i32) {
    %c0_i32 = arith.constant 0 : i32
    %c0_i32_0 = arith.constant 0 : i32
    %c0_i32_1 = arith.constant 0 : i32
    %c0_i32_2 = arith.constant 0 : i32
    return %c0_i32, %c0_i32_0, %c0_i32_1 : i32, i32, i32
  }
  func.func @transform_7(%arg0: i32) -> (i32, i32, i32) {
    %c0_i32 = arith.constant 0 : i32
    %c0_i32_0 = arith.constant 0 : i32
    %c0_i32_1 = arith.constant 0 : i32
    %c0_i32_2 = arith.constant 0 : i32
    return %c0_i32, %c0_i32_0, %c0_i32_1 : i32, i32, i32
  }
  func.func @transform_8(%arg0: i32) -> (i32, i32, i32) {
    %c0_i32 = arith.constant 0 : i32
    %c0_i32_0 = arith.constant 0 : i32
    %c0_i32_1 = arith.constant 0 : i32
    %c0_i32_2 = arith.constant 0 : i32
    return %c0_i32, %c0_i32_0, %c0_i32_1 : i32, i32, i32
  }
  func.func @transform_9(%arg0: i32) -> (i32, i32) {
    %c0_i32 = arith.constant 0 : i32
    %c0_i32_0 = arith.constant 0 : i32
    %c0_i32_1 = arith.constant 0 : i32
    return %c0_i32, %c0_i32_0 : i32, i32
  }
  func.func @transform_10(%arg0: i32) -> (i32, i32) {
    %c0_i32 = arith.constant 0 : i32
    %c0_i32_0 = arith.constant 0 : i32
    return %arg0, %c0_i32 : i32, i32
  }
}

</mosaic_0001>

<bundles_post_ra>
// kernel: scinet_forward.1
= control target key start
LH: loop header
LB: loop body
LE: loop exit
PB: predicated region body
PF: predicated region fallthrough
CT: control target
= control target key end

     0   :  { %15 = vsyncpa [#allocation3], 0  ;;  %s3254_s0 = inlined_call_operand.vmem [shape: f32[8,128], index: 0, kind: input, shape index: {}]   ;;  %s3255_s1 = inlined_call_operand.hbm [shape: bf16[3,128,256], index: 1, kind: input, shape index: {}]   ;;  %s3256_s2 = inlined_call_operand.vmem [shape: f32[3,1,256], index: 2, kind: input, shape index: {}]   ;;  %s3257_s3 = inlined_call_operand.hbm [shape: bf16[3,256,128], index: 3, kind: input, shape index: {}]   ;;  %s3258_s4 = inlined_call_operand.vmem [shape: f32[3,1,128], index: 4, kind: input, shape index: {}]   ;;  %s3259_s5 = inlined_call_operand.hbm [shape: bf16[3,128,256], index: 5, kind: input, shape index: {}]   ;;  %s3260_s6 = inlined_call_operand.vmem [shape: f32[3,1,256], index: 6, kind: input, shape index: {}]   ;;  %s3261_s7 = inlined_call_operand.hbm [shape: bf16[3,256,128], index: 7, kind: input, shape index: {}]   ;;  %s3262_s8 = inlined_call_operand.vmem [shape: f32[3,1,128], index: 8, kind: input, shape index: {}]   ;;  %s3263_s9 = inlined_call_operand.hbm [shape: bf16[128,128], index: 9, kind: input, shape index: {}]   ;;  %s3264_s10 = inlined_call_operand.vmem [shape: f32[8,128], index: 10, kind: output, shape index: {}]  }
   0x1   :  { %16 = vsyncpa [#allocation5], 0 }
   0x2   :  { %17 = vsyncpa [#allocation8], 0  ;;  %s3021_s13 = smov [#allocation4]   ;;  %s2905_s17 = scalar_lea.hbm %s3257_s3, 6144 }
   0x3   :  { %s39_s14 = sshll.u32 %s3021_s13, 4  ;;  %p2906_p0 = scmp.ne.s32.totalorder %s3257_s3, %s2905_s17  ;;  %s40_s14 = int_to_ptr.vmem [resolvable:$true] %s39_s14 }
   0x4   :  { %p2909_p1 = scmp.lt.u32.totalorder %s2905_s17, %s3257_s3 }
   0x6   :  { %p2911_p2 = pnand %p2909_p1, %p2906_p0 }
   0x8   :  { %2914 = shalt.err (!%p2911_p2)
}
   0x9   :  { %s2915_s22 = scalar_lea.vmem %s40_s14, 6144  ;;  %p2920_p4 = scmp.lt.s32.totalorder %s40_s14, %s40_s14 }
   0xa   :  { %p2916_p3 = scmp.ne.s32.totalorder %s40_s14, %s2915_s22  ;;  %p2921_p5 = scmp.lt.s32.totalorder %s2915_s22, %s2915_s22 }
   0xc   :  { %p2922_p6 = por %p2921_p5, %p2920_p4 }
   0xe   :  { %p2923_p7 = pnand %p2922_p6, %p2916_p3 }
  0x10   :  { %2926 = shalt.err (!%p2923_p7)
}
  0x11   :  { %s3022_s23 = smov 64   ;;  %s3023_s24 = smov 4  }
  0x12   :  { %45 = dma.hbm_to_vmem [thread:$0]  %s3257_s3, 6144, %s40_s14, [#allocation5], %s3022_s23, %s3022_s23, %s3023_s24  }
  0x13   :  { %s3024_s27 = smov [#allocation7]   ;;  %s3025_s29 = smov [#allocation2]  }
  0x14   :  { %s67_s28 = sshll.u32 %s3024_s27, 4  ;;  %s25_s30 = sshll.u32 %s3025_s29, 4  ;;  %s68_s28 = int_to_ptr.vmem [resolvable:$true] %s67_s28  ;;  %s26_s30 = int_to_ptr.vmem [resolvable:$true] %s25_s30 }
  0x15   :  { %s2927_s13 = scalar_lea.hbm %s3261_s7, 6144 }
  0x16   :  { %p2928_p8 = scmp.ne.s32.totalorder %s3261_s7, %s2927_s13  ;;  %p2931_p9 = scmp.lt.u32.totalorder %s2927_s13, %s3261_s7 }
  0x18   :  { %p2933_p10 = pnand %p2931_p9, %p2928_p8 }
  0x1a   :  { %2936 = shalt.err (!%p2933_p10)
}
  0x1b   :  { %s2937_s3 = scalar_lea.vmem %s68_s28, 6144  ;;  %p2942_p12 = scmp.lt.s32.totalorder %s68_s28, %s68_s28 }
  0x1c   :  { %p2938_p11 = scmp.ne.s32.totalorder %s68_s28, %s2937_s3  ;;  %p2943_p13 = scmp.lt.s32.totalorder %s2937_s3, %s2937_s3 }
  0x1e   :  { %p2944_p0 = por %p2943_p13, %p2942_p12 }
  0x20   :  { %p2945_p1 = pnand %p2944_p0, %p2938_p11 }
  0x22   :  { %2948 = shalt.err (!%p2945_p1)
}
  0x23   :  { %73 = dma.hbm_to_vmem [thread:$0]  %s3261_s7, 6144, %s68_s28, [#allocation8], %s3022_s23, %s3022_s23, %s3023_s24  }
  0x24   :  { %s2949_s22 = scalar_lea.hbm %s3255_s1, 6144 }
  0x25   :  { %p2950_p2 = scmp.ne.s32.totalorder %s3255_s1, %s2949_s22  ;;  %p2953_p3 = scmp.lt.u32.totalorder %s2949_s22, %s3255_s1 }
  0x27   :  { %p2955_p4 = pnand %p2953_p3, %p2950_p2 }
  0x29   :  { %2958 = shalt.err (!%p2955_p4)
}
  0x2a   :  { %s2959_s11 = scalar_lea.vmem %s26_s30, 6144  ;;  %p2964_p6 = scmp.lt.s32.totalorder %s26_s30, %s26_s30 }
  0x2b   :  { %p2960_p5 = scmp.ne.s32.totalorder %s26_s30, %s2959_s11  ;;  %p2965_p7 = scmp.lt.s32.totalorder %s2959_s11, %s2959_s11 }
  0x2d   :  { %p2966_p8 = por %p2965_p7, %p2964_p6 }
  0x2f   :  { %p2967_p9 = pnand %p2966_p8, %p2960_p5 }
  0x31   :  { %2970 = shalt.err (!%p2967_p9)
}
  0x32   :  { %s3026_s7 = smov 128   ;;  %s3027_s28 = smov 8  }
  0x33   :  { %31 = dma.hbm_to_vmem [thread:$0]  %s3255_s1, 6144, %s26_s30, [#allocation3], %s3026_s7, %s3026_s7, %s3027_s28  }
  0x34   :  { %s3028_s15 = smov [#allocation6]   ;;  %s3029_s17 = smov [#allocation9]  }
  0x35   :  { %s53_s16 = sshll.u32 %s3028_s15, 4  ;;  %s81_s18 = sshll.u32 %s3029_s17, 4  ;;  %s54_s16 = int_to_ptr.vmem [resolvable:$true] %s53_s16  ;;  %s82_s18 = int_to_ptr.vmem [resolvable:$true] %s81_s18 }
  0x36   :  { %s2971_s19 = scalar_lea.hbm %s3259_s5, 6144 }
  0x37   :  { %p2972_p10 = scmp.ne.s32.totalorder %s3259_s5, %s2971_s19  ;;  %p2975_p11 = scmp.lt.u32.totalorder %s2971_s19, %s3259_s5 }
  0x39   :  { %p2977_p12 = pnand %p2975_p11, %p2972_p10 }
  0x3b   :  { %2980 = shalt.err (!%p2977_p12)
}
  0x3c   :  { %s2981_s1 = scalar_lea.vmem %s54_s16, 6144  ;;  %p2986_p0 = scmp.lt.s32.totalorder %s54_s16, %s54_s16 }
  0x3d   :  { %p2982_p13 = scmp.ne.s32.totalorder %s54_s16, %s2981_s1  ;;  %p2987_p1 = scmp.lt.s32.totalorder %s2981_s1, %s2981_s1 }
  0x3f   :  { %p2988_p2 = por %p2987_p1, %p2986_p0 }
  0x41   :  { %p2989_p3 = pnand %p2988_p2, %p2982_p13 }
  0x43   :  { %2992 = shalt.err (!%p2989_p3)
}
  0x44   :  { %59 = dma.hbm_to_vmem [thread:$0]  %s3259_s5, 6144, %s54_s16, [#allocation5], %s3026_s7, %s3026_s7, %s3027_s28  }
  0x45   :  { %s2993_s11 = scalar_lea.hbm %s3263_s9, 1024 }
  0x46   :  { %p2994_p4 = scmp.ne.s32.totalorder %s3263_s9, %s2993_s11  ;;  %p2997_p5 = scmp.lt.u32.totalorder %s2993_s11, %s3263_s9 }
  0x48   :  { %p2999_p6 = pnand %p2997_p5, %p2994_p4 }
  0x4a   :  { %3002 = shalt.err (!%p2999_p6)
}
  0x4b   :  { %s3003_s3 = scalar_lea.vmem %s82_s18, 1024  ;;  %p3008_p8 = scmp.lt.s32.totalorder %s82_s18, %s82_s18 }
  0x4c   :  { %p3004_p7 = scmp.ne.s32.totalorder %s82_s18, %s3003_s3  ;;  %p3009_p9 = scmp.lt.s32.totalorder %s3003_s3, %s3003_s3 }
  0x4e   :  { %p3010_p10 = por %p3009_p9, %p3008_p8 }
  0x50   :  { %p3011_p11 = pnand %p3010_p10, %p3004_p7 }
  0x52   :  { %3014 = shalt.err (!%p3011_p11)
}
  0x53   :  { %87 = dma.hbm_to_vmem [thread:$0]  %s3263_s9, 1024, %s82_s18, [#allocation8], %s3022_s23, %s3022_s23, %s3023_s24  }
  0x54   :  { %3015 = dma.done.wait [#allocation3], 6144  }
  0x55   :  { %3016 = vsyncadd [#allocation3], 4294961152 }
  0x56   :  { %3017 = dma.done.wait [#allocation5], 12288  }
  0x57   :  { %3018 = vsyncadd [#allocation5], 4294955008 }
  0x58   :  { %3019 = dma.done.wait [#allocation8], 7168  }
  0x59   :  { %3020 = vsyncadd [#allocation8], 4294960128  ;;  %v3030_v0 = vmov 0   ;;  %v2638_v1 = vld [vmem:[#allocation2 + $0x4] ss:$8 sps:$4 sm:$0xff]   ;;  %v2666_v15 = vld [vmem:[#allocation4 + $0x50] sm:$0xff]   ;;  %v124_v35 = vlaneseq }
  0x5a   :  { %246 = vmatprep.mubr.bf16.mxu0 %v3030_v0  ;;  %v2640_v2 = vld [vmem:[#allocation2] ss:$8 sps:$4 sm:$0xff]   ;;  %214 = vmatprep.subr.bf16.mxu0 %v2638_v1  ;;  %v2641_v3 = vld [vmem:[#allocation2 + $0x14] ss:$8 sps:$4 sm:$0xff]   ;;  %v2643_v4 = vld [vmem:[#allocation2 + $0x10] ss:$8 sps:$4 sm:$0xff]  }
  0x5b   :  { %215 = vmatpush1.bf16.msra.mxu0 %v2640_v2  ;;  %v2644_v5 = vld [vmem:[#allocation2 + $0x24] ss:$8 sps:$4 sm:$0xff]   ;;  %v2646_v6 = vld [vmem:[#allocation2 + $0x20] ss:$8 sps:$4 sm:$0xff]   ;;  %v2647_v7 = vld [vmem:[#allocation2 + $0x34] ss:$8 sps:$4 sm:$0xff]  }
  0x5c   :  { %216 = vmatprep.subr.bf16.mxu0 %v2641_v3  ;;  %v2649_v8 = vld [vmem:[#allocation2 + $0x30] ss:$8 sps:$4 sm:$0xff]   ;;  %v2650_v9 = vld [vmem:[#allocation2 + $0x44] ss:$8 sps:$4 sm:$0xff]   ;;  %v2652_v12 = vld [vmem:[#allocation2 + $0x40] ss:$8 sps:$4 sm:$0xff]  }
  0x5d   :  { %v2662_v10 = vld [vmem:[#allocation4 + $0x40] sm:$0xff]   ;;  %v2664_v13 = vld [vmem:[#allocation4 + $0x48] sm:$0xff]   ;;  %v2653_v16 = vld [vmem:[#allocation2 + $0x54] ss:$8 sps:$4 sm:$0xff]   ;;  %v125_v36 = vshrl.u32 %v124_v35, 7  ;;  %vm3032_vm12 = vmmov 0  }
  0x5e   :  { %v2663_v11 = vld [vmem:[#allocation4] sm:$0xff]   ;;  %2465 = vmatprep.subr.bf16.mxu1 %v2662_v10  ;;  %v2665_v14 = vld [vmem:[#allocation4 + $0x8] sm:$0xff]   ;;  %v2655_v17 = vld [vmem:[#allocation2 + $0x50] ss:$8 sps:$4 sm:$0xff]  }
  0x5f   :  { %217 = vmatpush1.bf16.msra.mxu0 %v2643_v4  ;;  %2466 = vmatpush3.bf16.msra.mxu1 %v2663_v11  ;;  %v2667_v18 = vld [vmem:[#allocation4 + $0x10] sm:$0xff]   ;;  %v2668_v19 = vld [vmem:[#allocation4 + $0x58] sm:$0xff]   ;;  %v2656_v20 = vld [vmem:[#allocation2 + $0x64] ss:$8 sps:$4 sm:$0xff]   ;;  %v3166_v37 = vsub.s32 0, %v125_v36  ;;  %v3171_v39 = vsub.s32 1, %v125_v36 }
  0x60   :  { %218 = vmatprep.subr.bf16.mxu0 %v2644_v5  ;;  %2467 = vmatprep.subr.bf16.mxu1 %v2664_v13  ;;  %v2658_v21 = vld [vmem:[#allocation2 + $0x60] ss:$8 sps:$4 sm:$0xff]   ;;  %v2659_v22 = vld [vmem:[#allocation2 + $0x74] ss:$8 sps:$4 sm:$0xff]   ;;  %v2661_v26 = vld [vmem:[#allocation2 + $0x70] ss:$8 sps:$4 sm:$0xff]  }
  0x61   :  { %v2669_v23 = vld [vmem:[#allocation4 + $0x18] sm:$0xff]   ;;  %v2670_v24 = vld [vmem:[#allocation4 + $0x60] sm:$0xff]   ;;  %v2672_v28 = vld [vmem:[#allocation4 + $0x68] sm:$0xff]  }
  0x62   :  { %v2671_v25 = vld [vmem:[#allocation4 + $0x20] sm:$0xff]   ;;  %v2673_v29 = vld [vmem:[#allocation4 + $0x28] sm:$0xff]   ;;  %v2674_v31 = vld [vmem:[#allocation4 + $0x70] sm:$0xff]  }
  0x63   :  { %219 = vmatpush1.bf16.msra.mxu0 %v2646_v6  ;;  %2468 = vmatpush3.bf16.msra.mxu1 %v2665_v14  ;;  %v3161_v27 = vld [vmem:[%s3254_s0] sm:$0xff]  ;;  %v2675_v32 = vld [vmem:[#allocation4 + $0x30] sm:$0xff]   ;;  %v2676_v33 = vld [vmem:[#allocation4 + $0x78] sm:$0xff]  }
  0x64   :  { %220 = vmatprep.subr.bf16.mxu0 %v2647_v7  ;;  %2469 = vmatprep.subr.bf16.mxu1 %v2666_v15  ;;  %v121_v30 = vpack.c.bf16 %v3161_v27, %v3161_v27  ;;  %v2677_v34 = vld [vmem:[#allocation4 + $0x38] sm:$0xff]   ;;  %v122_v38 = vld [vmem:[%s3256_s2] sm:$0x3]  ;;  %v2680_v54 = vld [vmem:[#allocation6 + $0x4] ss:$8 sps:$4 sm:$0xff]  }
  0x65   :  { %v127_v40 = vrot.slane %v122_v38, %v3166_v37  ;;  %v131_v41 = vrot.slane %v122_v38, %v3171_v39  ;;  %v2678_v55 = vld [vmem:[#allocation6] ss:$8 sps:$4 sm:$0xff]   ;;  %v2683_v56 = vld [vmem:[#allocation6 + $0x14] ss:$8 sps:$4 sm:$0xff]   ;;  %v2681_v57 = vld [vmem:[#allocation6 + $0x10] ss:$8 sps:$4 sm:$0xff]  }
  0x66   :  { %v2686_v58 = vld [vmem:[#allocation6 + $0x24] ss:$8 sps:$4 sm:$0xff]   ;;  %v2684_v59 = vld [vmem:[#allocation6 + $0x20] ss:$8 sps:$4 sm:$0xff]   ;;  %v2689_v60 = vld [vmem:[#allocation6 + $0x34] ss:$8 sps:$4 sm:$0xff]  }
  0x67   :  { %221 = vmatpush1.bf16.msra.mxu0 %v2649_v8  ;;  %2470 = vmatpush3.bf16.msra.mxu1 %v2667_v18  ;;  %v2687_v61 = vld [vmem:[#allocation6 + $0x30] ss:$8 sps:$4 sm:$0xff]   ;;  %v2692_v62 = vld [vmem:[#allocation6 + $0x44] ss:$8 sps:$4 sm:$0xff]   ;;  %v2690_v63 = vld [vmem:[#allocation6 + $0x40] ss:$8 sps:$4 sm:$0xff]  }
  0x68   :  { %222 = vmatprep.subr.bf16.mxu0 %v2650_v9  ;;  %2471 = vmatprep.subr.bf16.mxu1 %v2668_v19  ;;  %v2693_v1 = vld [vmem:[#allocation6 + $0x50] ss:$8 sps:$4 sm:$0xff]   ;;  %v2695_v2 = vld [vmem:[#allocation6 + $0x54] ss:$8 sps:$4 sm:$0xff]   ;;  %v2698_v3 = vld [vmem:[#allocation6 + $0x64] ss:$8 sps:$4 sm:$0xff]  }
  0x69   :  { %v2696_v4 = vld [vmem:[#allocation6 + $0x60] ss:$8 sps:$4 sm:$0xff]   ;;  %v2701_v5 = vld [vmem:[#allocation6 + $0x74] ss:$8 sps:$4 sm:$0xff]   ;;  %v2699_v6 = vld [vmem:[#allocation6 + $0x70] ss:$8 sps:$4 sm:$0xff]  }
  0x6a   :  { %v2702_v7 = vld [vmem:[#allocation7 + $0x40] sm:$0xff]   ;;  %v2704_v9 = vld [vmem:[#allocation7 + $0x48] sm:$0xff]   ;;  %v2706_v11 = vld [vmem:[#allocation7 + $0x50] sm:$0xff]  }
  0x6b   :  { %223 = vmatpush1.bf16.msra.mxu0 %v2652_v12  ;;  %2472 = vmatpush3.bf16.msra.mxu1 %v2669_v23  ;;  %v2703_v8 = vld [vmem:[#allocation7] sm:$0xff]   ;;  %v2705_v10 = vld [vmem:[#allocation7 + $0x8] sm:$0xff]   ;;  %v2707_v12 = vld [vmem:[#allocation7 + $0x10] sm:$0xff]  }
  0x6c   :  { %224 = vmatprep.subr.bf16.mxu0 %v2653_v16  ;;  %2473 = vmatprep.subr.bf16.mxu1 %v2670_v24  ;;  %v2708_v13 = vld [vmem:[#allocation7 + $0x58] sm:$0xff]   ;;  %v2710_v15 = vld [vmem:[#allocation7 + $0x60] sm:$0xff]   ;;  %v2713_v18 = vld [vmem:[#allocation7 + $0x28] sm:$0xff]  }
  0x6d   :  { %v2709_v14 = vld [vmem:[#allocation7 + $0x18] sm:$0xff]   ;;  %v2711_v16 = vld [vmem:[#allocation7 + $0x20] sm:$0xff]  }
  0x6e   :  { %v2717_v35 = vld [vmem:[#allocation7 + $0x38] sm:$0xff]   ;;  %v2718_v36 = vld [vmem:[#allocation2 + $0x80] ss:$8 sps:$4 sm:$0xff]   ;;  %v2720_v38 = vld [vmem:[#allocation2 + $0x84] ss:$8 sps:$4 sm:$0xff]  }
  0x6f   :  { %225 = vmatpush1.bf16.msra.mxu0 %v2655_v17  ;;  %2474 = vmatpush3.bf16.msra.mxu1 %v2671_v25  ;;  %v2712_v17 = vld [vmem:[#allocation7 + $0x68] sm:$0xff]  }
  0x70   :  { %226 = vmatprep.subr.bf16.mxu0 %v2656_v20  ;;  %2475 = vmatprep.subr.bf16.mxu1 %v2672_v28  ;;  %v2267_v20 = vld [vmem:[%s3258_s4] ss:$0 sm:$0xff] }
  0x73   :  { %227 = vmatpush1.bf16.msra.mxu0 %v2658_v21  ;;  %2476 = vmatpush3.bf16.msra.mxu1 %v2673_v29 }
  0x74   :  { %228 = vmatprep.subr.bf16.mxu0 %v2659_v22  ;;  %2477 = vmatprep.subr.bf16.mxu1 %v2674_v31 }
  0x77   :  { %229 = vmatpush1.bf16.msra.mxu0 %v2661_v26  ;;  %2478 = vmatpush3.bf16.msra.mxu1 %v2675_v32  ;;  %v2714_v32 = vld [vmem:[#allocation7 + $0x70] sm:$0xff]  }
  0x78   :  { %2479 = vmatprep.subr.bf16.mxu1 %v2676_v33  ;;  %551 = vmatprep.subr.bf16.mxu0 %v2680_v54  ;;  %v2715_v33 = vld [vmem:[#allocation7 + $0x30] sm:$0xff]  }
  0x7a   :  { %247 = vmatmul.mubr.bf16.vlgmr.msra.gmra.mrb[0].mxu0 %v121_v30 }
  0x7b   :  { %583 = vmatprep.mubr.bf16.mxu0 %v3030_v0  ;;  %2480 = vmatpush3.bf16.msra.mxu1 %v2677_v34  ;;  %v2716_v34 = vld [vmem:[#allocation7 + $0x78] sm:$0xff]  }
  0x7c   :  { %552 = vmatpush1.bf16.msra.mxu0 %v2678_v55  ;;  %2487 = vmatprep.subr.bf16.mxu1 %v2702_v7  ;;  %v2744_v7 = vld [vmem:[#allocation4 + $0xc8] sm:$0xff]  }
  0x7d   :  { %553 = vmatprep.subr.bf16.mxu0 %v2683_v56 }
  0x80   :  { %554 = vmatpush1.bf16.msra.mxu0 %v2681_v57 }
  0x81   :  { %555 = vmatprep.subr.bf16.mxu0 %v2686_v58  ;;  %v2729_v58 = vld [vmem:[#allocation2 + $0xb4] ss:$8 sps:$4 sm:$0xff]  }
  0x84   :  { %556 = vmatpush1.bf16.msra.mxu0 %v2684_v59  ;;  %v2727_v59 = vld [vmem:[#allocation2 + $0xb0] ss:$8 sps:$4 sm:$0xff]  }
  0x85   :  { %557 = vmatprep.subr.bf16.mxu0 %v2689_v60  ;;  %v2732_v60 = vld [vmem:[#allocation2 + $0xc4] ss:$8 sps:$4 sm:$0xff]  }
  0x88   :  { %558 = vmatpush1.bf16.msra.mxu0 %v2687_v61  ;;  %v2730_v61 = vld [vmem:[#allocation2 + $0xc0] ss:$8 sps:$4 sm:$0xff]  }
  0x89   :  { %559 = vmatprep.subr.bf16.mxu0 %v2692_v62  ;;  %v2733_v62 = vld [vmem:[#allocation2 + $0xd0] ss:$8 sps:$4 sm:$0xff]  }
  0x8c   :  { %560 = vmatpush1.bf16.msra.mxu0 %v2690_v63  ;;  %v2735_v63 = vld [vmem:[#allocation2 + $0xd4] ss:$8 sps:$4 sm:$0xff]  }
  0x8d   :  { %561 = vmatprep.subr.bf16.mxu0 %v2695_v2  ;;  %v2736_v2 = vld [vmem:[#allocation2 + $0xe0] ss:$8 sps:$4 sm:$0xff]  }
  0x90   :  { %562 = vmatpush1.bf16.msra.mxu0 %v2693_v1  ;;  %v2738_v1 = vld [vmem:[#allocation2 + $0xe4] ss:$8 sps:$4 sm:$0xff]  }
  0x91   :  { %563 = vmatprep.subr.bf16.mxu0 %v2698_v3  ;;  %v2741_v3 = vld [vmem:[#allocation2 + $0xf4] ss:$8 sps:$4 sm:$0xff]  }
  0x94   :  { %564 = vmatpush1.bf16.msra.mxu0 %v2696_v4  ;;  %v2739_v4 = vld [vmem:[#allocation2 + $0xf0] ss:$8 sps:$4 sm:$0xff]  }
  0x95   :  { %565 = vmatprep.subr.bf16.mxu0 %v2701_v5  ;;  %v2742_v5 = vld [vmem:[#allocation4 + $0xc0] sm:$0xff]  }
  0x98   :  { %566 = vmatpush1.bf16.msra.mxu0 %v2699_v6  ;;  %v2743_v6 = vld [vmem:[#allocation4 + $0x80] sm:$0xff]  }
  0x99   :  { %888 = vmatprep.subr.bf16.mxu0 %v2720_v38 }
 0x14d   :  { %v248_v42 = vpop.f32.mrb[0].mxu0 }
 0x14e   :  { %v249_v43 = vadd.f32 %v248_v42, %v127_v40  ;;  %v250_v44 = vpop.f32.mrb[1].mxu0  ;;  %v2723_v40 = vld [vmem:[#allocation2 + $0x94] ss:$8 sps:$4 sm:$0xff]   ;;  %v2724_v42 = vld [vmem:[#allocation2 + $0xa0] ss:$8 sps:$4 sm:$0xff]  }
 0x14f   :  { %v251_v45 = vadd.f32 %v250_v44, %v131_v41  ;;  %v252_v46 = vpop.f32.mrb[2].mxu0  ;;  %v2726_v41 = vld [vmem:[#allocation2 + $0xa4] ss:$8 sps:$4 sm:$0xff]  }
 0x150   :  { %vm255_vm0 = vcmp.gt.f32.partialorder %v249_v43, 0.0  ;;  %v257_v47 = vmul.f32 0.01, %v249_v43  ;;  %v253_v48 = vpop.f32.mrb[3].mxu0 }
 0x151   :  { %vm256_vm1 = vcmp.gt.f32.partialorder %v251_v45, 0.0  ;;  %v258_v49 = vmul.f32 0.01, %v251_v45 }
 0x152   :  { %v259_v50 = vsel %vm255_vm0, %v249_v43, %v257_v47  ;;  %v459_v43 = vld [vmem:[%s3260_s6] sm:$0x3] }
 0x153   :  { %v260_v51 = vsel %vm256_vm1, %v251_v45, %v258_v49  ;;  %v293_v53 = vpack.c.bf16 %v259_v50, %v259_v50  ;;  %v464_v44 = vrot.slane %v459_v43, %v3166_v37  ;;  %v468_v45 = vrot.slane %v459_v43, %v3171_v39 }
 0x154   :  { %v294_v52 = vpack.c.bf16 %v260_v51, %v260_v51 }
 0x156   :  { %430 = vmatprep.mubr.bf16.mxu1 %v294_v52 }
 0x157   :  { %431 = vmatmul.mubr.bf16.vlgmr.msra.gmra.mrb[0].mxu1 %v293_v53 }
 0x158   :  { %2488 = vmatpush3.bf16.msra.mxu1 %v2703_v8  ;;  %v2745_v8 = vld [vmem:[#allocation4 + $0x88] sm:$0xff]  }
 0x159   :  { %2489 = vmatprep.subr.bf16.mxu1 %v2704_v9  ;;  %v2746_v9 = vld [vmem:[#allocation4 + $0xd0] sm:$0xff]  }
 0x15c   :  { %2490 = vmatpush3.bf16.msra.mxu1 %v2705_v10  ;;  %v2747_v10 = vld [vmem:[#allocation4 + $0x90] sm:$0xff]  }
 0x15d   :  { %2491 = vmatprep.subr.bf16.mxu1 %v2706_v11  ;;  %v2748_v11 = vld [vmem:[#allocation4 + $0xd8] sm:$0xff]  }
 0x160   :  { %2492 = vmatpush3.bf16.msra.mxu1 %v2707_v12  ;;  %v2749_v12 = vld [vmem:[#allocation4 + $0x98] sm:$0xff]  }
 0x161   :  { %2493 = vmatprep.subr.bf16.mxu1 %v2708_v13  ;;  %v2750_v13 = vld [vmem:[#allocation4 + $0xe0] sm:$0xff]  }
 0x164   :  { %2494 = vmatpush3.bf16.msra.mxu1 %v2709_v14  ;;  %v2751_v14 = vld [vmem:[#allocation4 + $0xa0] sm:$0xff]  }
 0x165   :  { %2495 = vmatprep.subr.bf16.mxu1 %v2710_v15  ;;  %v2752_v15 = vld [vmem:[#allocation4 + $0xe8] sm:$0xff]  }
 0x168   :  { %2496 = vmatpush3.bf16.msra.mxu1 %v2711_v16  ;;  %v2753_v16 = vld [vmem:[#allocation4 + $0xa8] sm:$0xff]  }
 0x169   :  { %2497 = vmatprep.subr.bf16.mxu1 %v2712_v17 }
 0x16c   :  { %2498 = vmatpush3.bf16.msra.mxu1 %v2713_v18  ;;  %v2300_v18 = vld [vmem:[%s3262_s8] ss:$0 sm:$0xff] }
 0x16d   :  { %2499 = vmatprep.subr.bf16.mxu1 %v2714_v32  ;;  %v2757_v32 = vld [vmem:[#allocation4 + $0xb8] sm:$0xff]  }
 0x170   :  { %2500 = vmatpush3.bf16.msra.mxu1 %v2715_v33  ;;  %v2317_v33 = vld [vmem:[%s3256_s2 + $0x2] sm:$0x3] }
 0x171   :  { %2501 = vmatprep.subr.bf16.mxu1 %v2716_v34  ;;  %v805_v34 = vrot.slane %v2317_v33, %v3171_v39 }
 0x174   :  { %2502 = vmatpush3.bf16.msra.mxu1 %v2717_v35 }
 0x175   :  { %2509 = vmatprep.subr.bf16.mxu1 %v2742_v5  ;;  %v2786_v5 = vld [vmem:[#allocation7 + $0xd0] sm:$0xff]  }
 0x22a   :  { %v2481_v19 = vpop.f32.mrb[0].mxu1 }
 0x22b   :  { %v2482_v21 = vpop.f32.mrb[1].mxu1 }
 0x22c   :  { %v2483_v22 = vadd.f32 %v2482_v21, %v2481_v19  ;;  %v2484_v23 = vpop.f32.mrb[2].mxu1 }
 0x22d   :  { %v2485_v24 = vpop.f32.mrb[3].mxu1 }
 0x22e   :  { %v433_v25 = vadd.f32 %v2483_v22, %v2267_v20 }
 0x230   :  { %2886 = vtanh.f32 %v433_v25 }
 0x23a   :  { %v2887_v26 = vpop.eup %2886 }
 0x23b   :  { %v439_v28 = vmul.f32 1.442695, %v2887_v26 }
 0x23d   :  { %2888 = vpow2.f32 %v439_v28  ;;  %v2754_v28 = vld [vmem:[#allocation4 + $0xf0] sm:$0xff]  }
 0x247   :  { %v2889_v29 = vpop.eup %2888 }
 0x248   :  { %v3179_v30 = vmul.f32 %v2889_v29, %v3161_v27  ;;  %v2721_v27 = vld [vmem:[#allocation2 + $0x90] ss:$8 sps:$4 sm:$0xff]  }
 0x249   :  { %v2755_v29 = vld [vmem:[#allocation4 + $0xb0] sm:$0xff]  }
 0x24a   :  { %v458_v31 = vpack.c.bf16 %v3179_v30, %v3179_v30 }
 0x24c   :  { %584 = vmatmul.mubr.bf16.vlgmr.msra.gmra.mrb[4].mxu0 %v458_v31  ;;  %v2756_v31 = vld [vmem:[#allocation4 + $0xf8] sm:$0xff]  }
 0x24d   :  { %920 = vmatprep.mubr.bf16.mxu0 %v3030_v0  ;;  %889 = vmatpush1.bf16.msra.mxu0 %v2718_v36 }
 0x24e   :  { %890 = vmatprep.subr.bf16.mxu0 %v2723_v40 }
 0x251   :  { %891 = vmatpush1.bf16.msra.mxu0 %v2721_v27 }
 0x252   :  { %892 = vmatprep.subr.bf16.mxu0 %v2726_v41 }
 0x255   :  { %893 = vmatpush1.bf16.msra.mxu0 %v2724_v42 }
 0x256   :  { %894 = vmatprep.subr.bf16.mxu0 %v2729_v58  ;;  %v2773_v58 = vld [vmem:[#allocation6 + $0xd0] ss:$8 sps:$4 sm:$0xff]  }
 0x259   :  { %895 = vmatpush1.bf16.msra.mxu0 %v2727_v59  ;;  %v2775_v59 = vld [vmem:[#allocation6 + $0xd4] ss:$8 sps:$4 sm:$0xff]  }
 0x25a   :  { %896 = vmatprep.subr.bf16.mxu0 %v2732_v60  ;;  %v2778_v60 = vld [vmem:[#allocation6 + $0xe4] ss:$8 sps:$4 sm:$0xff]  }
 0x25d   :  { %897 = vmatpush1.bf16.msra.mxu0 %v2730_v61  ;;  %v2776_v61 = vld [vmem:[#allocation6 + $0xe0] ss:$8 sps:$4 sm:$0xff]  }
 0x25e   :  { %898 = vmatprep.subr.bf16.mxu0 %v2735_v63  ;;  %v2779_v63 = vld [vmem:[#allocation6 + $0xf0] ss:$8 sps:$4 sm:$0xff]  }
 0x261   :  { %899 = vmatpush1.bf16.msra.mxu0 %v2733_v62  ;;  %v2781_v62 = vld [vmem:[#allocation6 + $0xf4] ss:$8 sps:$4 sm:$0xff]  }
 0x262   :  { %900 = vmatprep.subr.bf16.mxu0 %v2738_v1  ;;  %v2782_v1 = vld [vmem:[#allocation7 + $0xc0] sm:$0xff]  }
 0x265   :  { %901 = vmatpush1.bf16.msra.mxu0 %v2736_v2  ;;  %v2783_v2 = vld [vmem:[#allocation7 + $0x80] sm:$0xff]  }
 0x266   :  { %902 = vmatprep.subr.bf16.mxu0 %v2741_v3  ;;  %v2784_v3 = vld [vmem:[#allocation7 + $0xc8] sm:$0xff]  }
 0x269   :  { %903 = vmatpush1.bf16.msra.mxu0 %v2739_v4  ;;  %v2785_v4 = vld [vmem:[#allocation7 + $0x88] sm:$0xff]  }
 0x31f   :  { %v585_v46 = vpop.f32.mrb[4].mxu0 }
 0x320   :  { %v586_v47 = vadd.f32 %v585_v46, %v464_v44  ;;  %v587_v48 = vpop.f32.mrb[5].mxu0 }
 0x321   :  { %v588_v49 = vadd.f32 %v587_v48, %v468_v45  ;;  %v589_v50 = vpop.f32.mrb[6].mxu0  ;;  %v2760_v48 = vld [vmem:[#allocation6 + $0x84] ss:$8 sps:$4 sm:$0xff]  }
 0x322   :  { %vm592_vm2 = vcmp.gt.f32.partialorder %v586_v47, 0.0  ;;  %v594_v51 = vmul.f32 0.01, %v586_v47  ;;  %v590_v52 = vpop.f32.mrb[7].mxu0  ;;  %1229 = vmatprep.subr.bf16.mxu0 %v2760_v48  ;;  %v2763_v50 = vld [vmem:[#allocation6 + $0x94] ss:$8 sps:$4 sm:$0xff]  }
 0x323   :  { %vm593_vm3 = vcmp.gt.f32.partialorder %v588_v49, 0.0  ;;  %v595_v53 = vmul.f32 0.01, %v588_v49  ;;  %v2766_v52 = vld [vmem:[#allocation6 + $0xa4] ss:$8 sps:$4 sm:$0xff]  }
 0x324   :  { %v596_v54 = vsel %vm592_vm2, %v586_v47, %v594_v51  ;;  %v2761_v51 = vld [vmem:[#allocation6 + $0x90] ss:$8 sps:$4 sm:$0xff]  }
 0x325   :  { %v597_v55 = vsel %vm593_vm3, %v588_v49, %v595_v53  ;;  %v630_v57 = vpack.c.bf16 %v596_v54, %v596_v54  ;;  %v2758_v49 = vld [vmem:[#allocation6 + $0x80] ss:$8 sps:$4 sm:$0xff]   ;;  %v2769_v54 = vld [vmem:[#allocation6 + $0xb4] ss:$8 sps:$4 sm:$0xff]  }
 0x326   :  { %v631_v56 = vpack.c.bf16 %v597_v55, %v597_v55  ;;  %v2764_v53 = vld [vmem:[#allocation6 + $0xa0] ss:$8 sps:$4 sm:$0xff]   ;;  %v2767_v55 = vld [vmem:[#allocation6 + $0xb0] ss:$8 sps:$4 sm:$0xff]  }
 0x328   :  { %767 = vmatprep.mubr.bf16.mxu1 %v631_v56  ;;  %v2772_v56 = vld [vmem:[#allocation6 + $0xc4] ss:$8 sps:$4 sm:$0xff]  }
 0x329   :  { %768 = vmatmul.mubr.bf16.vlgmr.msra.gmra.mrb[4].mxu1 %v630_v57  ;;  %v2770_v57 = vld [vmem:[#allocation6 + $0xc0] ss:$8 sps:$4 sm:$0xff]  }
 0x32a   :  { %2510 = vmatpush3.bf16.msra.mxu1 %v2743_v6  ;;  %v2787_v6 = vld [vmem:[#allocation7 + $0x90] sm:$0xff]  }
 0x32b   :  { %2511 = vmatprep.subr.bf16.mxu1 %v2744_v7  ;;  %v2788_v7 = vld [vmem:[#allocation7 + $0xd8] sm:$0xff]  }
 0x32e   :  { %2512 = vmatpush3.bf16.msra.mxu1 %v2745_v8  ;;  %v2789_v8 = vld [vmem:[#allocation7 + $0x98] sm:$0xff]  }
 0x32f   :  { %2513 = vmatprep.subr.bf16.mxu1 %v2746_v9  ;;  %v2790_v9 = vld [vmem:[#allocation7 + $0xe0] sm:$0xff]  }
 0x332   :  { %2514 = vmatpush3.bf16.msra.mxu1 %v2747_v10  ;;  %v2791_v10 = vld [vmem:[#allocation7 + $0xa0] sm:$0xff]  }
 0x333   :  { %2515 = vmatprep.subr.bf16.mxu1 %v2748_v11  ;;  %v2792_v11 = vld [vmem:[#allocation7 + $0xe8] sm:$0xff]  }
 0x336   :  { %2516 = vmatpush3.bf16.msra.mxu1 %v2749_v12  ;;  %v2793_v12 = vld [vmem:[#allocation7 + $0xa8] sm:$0xff]  }
 0x337   :  { %2517 = vmatprep.subr.bf16.mxu1 %v2750_v13 }
 0x33a   :  { %2518 = vmatpush3.bf16.msra.mxu1 %v2751_v14  ;;  %v2335_v14 = vld [vmem:[%s3258_s4 + $0x1] ss:$0 sm:$0xff] }
 0x33b   :  { %2519 = vmatprep.subr.bf16.mxu1 %v2752_v15 }
 0x33e   :  { %2520 = vmatpush3.bf16.msra.mxu1 %v2753_v16 }
 0x33f   :  { %2521 = vmatprep.subr.bf16.mxu1 %v2754_v28  ;;  %v2795_v28 = vld [vmem:[#allocation7 + $0xb0] sm:$0xff]  }
 0x342   :  { %2522 = vmatpush3.bf16.msra.mxu1 %v2755_v29  ;;  %v2796_v29 = vld [vmem:[#allocation7 + $0xf8] sm:$0xff]  }
 0x343   :  { %2523 = vmatprep.subr.bf16.mxu1 %v2756_v31  ;;  %v2797_v31 = vld [vmem:[#allocation7 + $0xb8] sm:$0xff]  }
 0x346   :  { %2524 = vmatpush3.bf16.msra.mxu1 %v2757_v32  ;;  %v2798_v32 = vld [vmem:[#allocation2 + $0x100] ss:$8 sps:$4 sm:$0xff]  }
 0x347   :  { %2531 = vmatprep.subr.bf16.mxu1 %v2782_v1  ;;  %v2824_v1 = vld [vmem:[#allocation4 + $0x148] sm:$0xff]  }
 0x3fc   :  { %v2503_v17 = vpop.f32.mrb[4].mxu1 }
 0x3fd   :  { %v2504_v19 = vpop.f32.mrb[5].mxu1 }
 0x3fe   :  { %v2505_v20 = vadd.f32 %v2504_v19, %v2503_v17  ;;  %v2506_v21 = vpop.f32.mrb[6].mxu1 }
 0x3ff   :  { %v2507_v22 = vpop.f32.mrb[7].mxu1 }
 0x400   :  { %v770_v23 = vadd.f32 %v2505_v20, %v2300_v18 }
 0x402   :  { %2890 = vtanh.f32 %v770_v23 }
 0x40c   :  { %v2891_v24 = vpop.eup %2890 }
 0x40d   :  { %v3193_v25 = vadd.f32 %v2891_v24, %v3179_v30  ;;  %v801_v30 = vrot.slane %v2317_v33, %v3166_v37  ;;  %v2800_v33 = vld [vmem:[#allocation2 + $0x104] ss:$8 sps:$4 sm:$0xff]  }
 0x40f   :  { %v794_v26 = vpack.c.bf16 %v3193_v25, %v3193_v25 }
 0x411   :  { %921 = vmatmul.mubr.bf16.vlgmr.msra.gmra.mrb[8].mxu0 %v794_v26  ;;  %v2794_v26 = vld [vmem:[#allocation7 + $0xf0] sm:$0xff]  }
 0x412   :  { %1261 = vmatprep.mubr.bf16.mxu0 %v3030_v0  ;;  %1230 = vmatpush1.bf16.msra.mxu0 %v2758_v49 }
 0x413   :  { %1231 = vmatprep.subr.bf16.mxu0 %v2763_v50 }
 0x416   :  { %1232 = vmatpush1.bf16.msra.mxu0 %v2761_v51 }
 0x417   :  { %1233 = vmatprep.subr.bf16.mxu0 %v2766_v52  ;;  %v2809_v52 = vld [vmem:[#allocation2 + $0x134] ss:$8 sps:$4 sm:$0xff]  }
 0x41a   :  { %1234 = vmatpush1.bf16.msra.mxu0 %v2764_v53  ;;  %v2807_v53 = vld [vmem:[#allocation2 + $0x130] ss:$8 sps:$4 sm:$0xff]  }
 0x41b   :  { %1235 = vmatprep.subr.bf16.mxu0 %v2769_v54  ;;  %v2812_v54 = vld [vmem:[#allocation2 + $0x144] ss:$8 sps:$4 sm:$0xff]  }
 0x41e   :  { %1236 = vmatpush1.bf16.msra.mxu0 %v2767_v55  ;;  %v2810_v55 = vld [vmem:[#allocation2 + $0x140] ss:$8 sps:$4 sm:$0xff]  }
 0x41f   :  { %1237 = vmatprep.subr.bf16.mxu0 %v2772_v56  ;;  %v2813_v56 = vld [vmem:[#allocation2 + $0x150] ss:$8 sps:$4 sm:$0xff]  }
 0x422   :  { %1238 = vmatpush1.bf16.msra.mxu0 %v2770_v57  ;;  %v2815_v57 = vld [vmem:[#allocation2 + $0x154] ss:$8 sps:$4 sm:$0xff]  }
 0x423   :  { %1239 = vmatprep.subr.bf16.mxu0 %v2775_v59  ;;  %v2816_v59 = vld [vmem:[#allocation2 + $0x160] ss:$8 sps:$4 sm:$0xff]  }
 0x426   :  { %1240 = vmatpush1.bf16.msra.mxu0 %v2773_v58  ;;  %v2818_v58 = vld [vmem:[#allocation2 + $0x164] ss:$8 sps:$4 sm:$0xff]  }
 0x427   :  { %1241 = vmatprep.subr.bf16.mxu0 %v2778_v60  ;;  %v2821_v60 = vld [vmem:[#allocation2 + $0x174] ss:$8 sps:$4 sm:$0xff]  }
 0x42a   :  { %1242 = vmatpush1.bf16.msra.mxu0 %v2776_v61  ;;  %v2819_v61 = vld [vmem:[#allocation2 + $0x170] ss:$8 sps:$4 sm:$0xff]  }
 0x42b   :  { %1243 = vmatprep.subr.bf16.mxu0 %v2781_v62  ;;  %v2822_v62 = vld [vmem:[#allocation4 + $0x140] sm:$0xff]  }
 0x42e   :  { %1244 = vmatpush1.bf16.msra.mxu0 %v2779_v63  ;;  %v2823_v63 = vld [vmem:[#allocation4 + $0x100] sm:$0xff]  }
 0x42f   :  { %1568 = vmatprep.subr.bf16.mxu0 %v2800_v33 }
 0x4e4   :  { %v922_v35 = vpop.f32.mrb[8].mxu0 }
 0x4e5   :  { %v923_v36 = vadd.f32 %v922_v35, %v801_v30  ;;  %v924_v38 = vpop.f32.mrb[9].mxu0  ;;  %v2803_v30 = vld [vmem:[#allocation2 + $0x114] ss:$8 sps:$4 sm:$0xff]   ;;  %v2804_v35 = vld [vmem:[#allocation2 + $0x120] ss:$8 sps:$4 sm:$0xff]  }
 0x4e6   :  { %v925_v40 = vadd.f32 %v924_v38, %v805_v34  ;;  %v926_v27 = vpop.f32.mrb[10].mxu0  ;;  %v2806_v34 = vld [vmem:[#allocation2 + $0x124] ss:$8 sps:$4 sm:$0xff]  }
 0x4e7   :  { %vm929_vm4 = vcmp.gt.f32.partialorder %v923_v36, 0.0  ;;  %v931_v41 = vmul.f32 0.01, %v923_v36  ;;  %v927_v42 = vpop.f32.mrb[11].mxu0 }
 0x4e8   :  { %vm930_vm5 = vcmp.gt.f32.partialorder %v925_v40, 0.0  ;;  %v932_v43 = vmul.f32 0.01, %v925_v40 }
 0x4e9   :  { %v933_v44 = vsel %vm929_vm4, %v923_v36, %v931_v41  ;;  %v2352_v36 = vld [vmem:[%s3260_s6 + $0x2] sm:$0x3] }
 0x4ea   :  { %v934_v45 = vsel %vm930_vm5, %v925_v40, %v932_v43  ;;  %v968_v47 = vpack.c.bf16 %v933_v44, %v933_v44  ;;  %v1142_v38 = vrot.slane %v2352_v36, %v3166_v37  ;;  %v1146_v40 = vrot.slane %v2352_v36, %v3171_v39 }
 0x4eb   :  { %v969_v46 = vpack.c.bf16 %v934_v45, %v934_v45 }
 0x4ed   :  { %1106 = vmatprep.mubr.bf16.mxu1 %v969_v46 }
 0x4ee   :  { %1107 = vmatmul.mubr.bf16.vlgmr.msra.gmra.mrb[8].mxu1 %v968_v47 }
 0x4ef   :  { %2532 = vmatpush3.bf16.msra.mxu1 %v2783_v2  ;;  %v2825_v2 = vld [vmem:[#allocation4 + $0x108] sm:$0xff]  }
 0x4f0   :  { %2533 = vmatprep.subr.bf16.mxu1 %v2784_v3  ;;  %v2826_v3 = vld [vmem:[#allocation4 + $0x150] sm:$0xff]  }
 0x4f3   :  { %2534 = vmatpush3.bf16.msra.mxu1 %v2785_v4  ;;  %v2827_v4 = vld [vmem:[#allocation4 + $0x110] sm:$0xff]  }
 0x4f4   :  { %2535 = vmatprep.subr.bf16.mxu1 %v2786_v5  ;;  %v2828_v5 = vld [vmem:[#allocation4 + $0x158] sm:$0xff]  }
 0x4f7   :  { %2536 = vmatpush3.bf16.msra.mxu1 %v2787_v6  ;;  %v2829_v6 = vld [vmem:[#allocation4 + $0x118] sm:$0xff]  }
 0x4f8   :  { %2537 = vmatprep.subr.bf16.mxu1 %v2788_v7  ;;  %v2830_v7 = vld [vmem:[#allocation4 + $0x160] sm:$0xff]  }
 0x4fb   :  { %2538 = vmatpush3.bf16.msra.mxu1 %v2789_v8  ;;  %v2831_v8 = vld [vmem:[#allocation4 + $0x120] sm:$0xff]  }
 0x4fc   :  { %2539 = vmatprep.subr.bf16.mxu1 %v2790_v9  ;;  %v2832_v9 = vld [vmem:[#allocation4 + $0x168] sm:$0xff]  }
 0x4ff   :  { %2540 = vmatpush3.bf16.msra.mxu1 %v2791_v10  ;;  %v2833_v10 = vld [vmem:[#allocation4 + $0x128] sm:$0xff]  }
 0x500   :  { %2541 = vmatprep.subr.bf16.mxu1 %v2792_v11 }
 0x503   :  { %2542 = vmatpush3.bf16.msra.mxu1 %v2793_v12  ;;  %v2370_v12 = vld [vmem:[%s3262_s8 + $0x1] ss:$0 sm:$0xff] }
 0x504   :  { %2543 = vmatprep.subr.bf16.mxu1 %v2794_v26  ;;  %v2837_v26 = vld [vmem:[#allocation4 + $0x138] sm:$0xff]  }
 0x507   :  { %2544 = vmatpush3.bf16.msra.mxu1 %v2795_v28  ;;  %v2387_v28 = vld [vmem:[%s3256_s2 + $0x4] sm:$0x3] }
 0x508   :  { %2545 = vmatprep.subr.bf16.mxu1 %v2796_v29  ;;  %v1485_v29 = vrot.slane %v2387_v28, %v3171_v39 }
 0x50b   :  { %2546 = vmatpush3.bf16.msra.mxu1 %v2797_v31 }
 0x50c   :  { %2553 = vmatprep.subr.bf16.mxu1 %v2822_v62  ;;  %v2867_v62 = vld [vmem:[#allocation7 + $0x110] sm:$0xff]  }
 0x5c1   :  { %v2525_v13 = vpop.f32.mrb[8].mxu1 }
 0x5c2   :  { %v2526_v15 = vpop.f32.mrb[9].mxu1 }
 0x5c3   :  { %v2527_v16 = vadd.f32 %v2526_v15, %v2525_v13  ;;  %v2528_v17 = vpop.f32.mrb[10].mxu1 }
 0x5c4   :  { %v2529_v18 = vpop.f32.mrb[11].mxu1 }
 0x5c5   :  { %v1109_v19 = vadd.f32 %v2527_v16, %v2335_v14 }
 0x5c7   :  { %2892 = vtanh.f32 %v1109_v19 }
 0x5d1   :  { %v2893_v20 = vpop.eup %2892 }
 0x5d2   :  { %v1115_v21 = vmul.f32 1.442695, %v2893_v20 }
 0x5d4   :  { %2894 = vpow2.f32 %v1115_v21  ;;  %v2834_v21 = vld [vmem:[#allocation4 + $0x170] sm:$0xff]  }
 0x5de   :  { %v2895_v22 = vpop.eup %2894 }
 0x5df   :  { %v3207_v23 = vmul.f32 %v2895_v22, %v3193_v25  ;;  %v2801_v25 = vld [vmem:[#allocation2 + $0x110] ss:$8 sps:$4 sm:$0xff]  }
 0x5e0   :  { %v2835_v22 = vld [vmem:[#allocation4 + $0x130] sm:$0xff]  }
 0x5e1   :  { %v1135_v24 = vpack.c.bf16 %v3207_v23, %v3207_v23 }
 0x5e3   :  { %1262 = vmatmul.mubr.bf16.vlgmr.msra.gmra.mrb[12].mxu0 %v1135_v24  ;;  %v2836_v24 = vld [vmem:[#allocation4 + $0x178] sm:$0xff]  }
 0x5e4   :  { %1600 = vmatprep.mubr.bf16.mxu0 %v3030_v0  ;;  %1569 = vmatpush1.bf16.msra.mxu0 %v2798_v32 }
 0x5e5   :  { %1570 = vmatprep.subr.bf16.mxu0 %v2803_v30 }
 0x5e8   :  { %1571 = vmatpush1.bf16.msra.mxu0 %v2801_v25 }
 0x5e9   :  { %1572 = vmatprep.subr.bf16.mxu0 %v2806_v34 }
 0x5ec   :  { %1573 = vmatpush1.bf16.msra.mxu0 %v2804_v35 }
 0x5ed   :  { %1574 = vmatprep.subr.bf16.mxu0 %v2809_v52  ;;  %v2855_v52 = vld [vmem:[#allocation6 + $0x154] ss:$8 sps:$4 sm:$0xff]  }
 0x5f0   :  { %1575 = vmatpush1.bf16.msra.mxu0 %v2807_v53  ;;  %v2858_v53 = vld [vmem:[#allocation6 + $0x164] ss:$8 sps:$4 sm:$0xff]  }
 0x5f1   :  { %1576 = vmatprep.subr.bf16.mxu0 %v2812_v54  ;;  %v2856_v54 = vld [vmem:[#allocation6 + $0x160] ss:$8 sps:$4 sm:$0xff]  }
 0x5f4   :  { %1577 = vmatpush1.bf16.msra.mxu0 %v2810_v55  ;;  %v2861_v55 = vld [vmem:[#allocation6 + $0x174] ss:$8 sps:$4 sm:$0xff]  }
 0x5f5   :  { %1578 = vmatprep.subr.bf16.mxu0 %v2815_v57  ;;  %v2862_v57 = vld [vmem:[#allocation7 + $0x140] sm:$0xff]  }
 0x5f8   :  { %1579 = vmatpush1.bf16.msra.mxu0 %v2813_v56  ;;  %v2859_v56 = vld [vmem:[#allocation6 + $0x170] ss:$8 sps:$4 sm:$0xff]  }
 0x5f9   :  { %1580 = vmatprep.subr.bf16.mxu0 %v2818_v58  ;;  %v2863_v58 = vld [vmem:[#allocation7 + $0x100] sm:$0xff]  }
 0x5fc   :  { %1581 = vmatpush1.bf16.msra.mxu0 %v2816_v59  ;;  %v2864_v59 = vld [vmem:[#allocation7 + $0x148] sm:$0xff]  }
 0x5fd   :  { %1582 = vmatprep.subr.bf16.mxu0 %v2821_v60  ;;  %v2865_v60 = vld [vmem:[#allocation7 + $0x108] sm:$0xff]  }
 0x600   :  { %1583 = vmatpush1.bf16.msra.mxu0 %v2819_v61  ;;  %v2866_v61 = vld [vmem:[#allocation7 + $0x150] sm:$0xff]  }
 0x6b6   :  { %v1263_v27 = vpop.f32.mrb[12].mxu0 }
 0x6b7   :  { %v1264_v41 = vadd.f32 %v1263_v27, %v1142_v38  ;;  %v1265_v42 = vpop.f32.mrb[13].mxu0 }
 0x6b8   :  { %v1266_v43 = vadd.f32 %v1265_v42, %v1146_v40  ;;  %v1267_v44 = vpop.f32.mrb[14].mxu0  ;;  %v2838_v42 = vld [vmem:[#allocation6 + $0x100] ss:$8 sps:$4 sm:$0xff]  }
 0x6b9   :  { %vm1270_vm6 = vcmp.gt.f32.partialorder %v1264_v41, 0.0  ;;  %v1272_v45 = vmul.f32 0.01, %v1264_v41  ;;  %v1268_v46 = vpop.f32.mrb[15].mxu0  ;;  %v2841_v44 = vld [vmem:[#allocation6 + $0x110] ss:$8 sps:$4 sm:$0xff]  }
 0x6ba   :  { %vm1271_vm7 = vcmp.gt.f32.partialorder %v1266_v43, 0.0  ;;  %v1273_v47 = vmul.f32 0.01, %v1266_v43  ;;  %v2844_v46 = vld [vmem:[#allocation6 + $0x120] ss:$8 sps:$4 sm:$0xff]  }
 0x6bb   :  { %v1274_v48 = vsel %vm1270_vm6, %v1264_v41, %v1272_v45  ;;  %v2840_v41 = vld [vmem:[#allocation6 + $0x104] ss:$8 sps:$4 sm:$0xff]  }
 0x6bc   :  { %v1275_v49 = vsel %vm1271_vm7, %v1266_v43, %v1273_v47  ;;  %v1309_v51 = vpack.c.bf16 %v1274_v48, %v1274_v48  ;;  %1909 = vmatprep.subr.bf16.mxu0 %v2840_v41  ;;  %v2843_v43 = vld [vmem:[#allocation6 + $0x114] ss:$8 sps:$4 sm:$0xff]   ;;  %v2846_v45 = vld [vmem:[#allocation6 + $0x124] ss:$8 sps:$4 sm:$0xff]   ;;  %v2847_v48 = vld [vmem:[#allocation6 + $0x130] ss:$8 sps:$4 sm:$0xff]  }
 0x6bd   :  { %v1310_v50 = vpack.c.bf16 %v1275_v49, %v1275_v49  ;;  %v2849_v47 = vld [vmem:[#allocation6 + $0x134] ss:$8 sps:$4 sm:$0xff]   ;;  %v2852_v49 = vld [vmem:[#allocation6 + $0x144] ss:$8 sps:$4 sm:$0xff]  }
 0x6be   :  { %v2880_v41 = vld [vmem:[#allocation9 + $0x10] sm:$0xff]  }
 0x6bf   :  { %1447 = vmatprep.mubr.bf16.mxu1 %v1310_v50  ;;  %v2850_v50 = vld [vmem:[#allocation6 + $0x140] ss:$8 sps:$4 sm:$0xff]  }
 0x6c0   :  { %1448 = vmatmul.mubr.bf16.vlgmr.msra.gmra.mrb[12].mxu1 %v1309_v51  ;;  %v2853_v51 = vld [vmem:[#allocation6 + $0x150] ss:$8 sps:$4 sm:$0xff]  }
 0x6c1   :  { %2554 = vmatpush3.bf16.msra.mxu1 %v2823_v63  ;;  %v2868_v63 = vld [vmem:[#allocation7 + $0x158] sm:$0xff]  }
 0x6c2   :  { %2555 = vmatprep.subr.bf16.mxu1 %v2824_v1  ;;  %v2869_v1 = vld [vmem:[#allocation7 + $0x118] sm:$0xff]  }
 0x6c5   :  { %2556 = vmatpush3.bf16.msra.mxu1 %v2825_v2  ;;  %v2870_v2 = vld [vmem:[#allocation7 + $0x160] sm:$0xff]  }
 0x6c6   :  { %2557 = vmatprep.subr.bf16.mxu1 %v2826_v3  ;;  %v2871_v3 = vld [vmem:[#allocation7 + $0x120] sm:$0xff]  }
 0x6c9   :  { %2558 = vmatpush3.bf16.msra.mxu1 %v2827_v4  ;;  %v2872_v4 = vld [vmem:[#allocation7 + $0x168] sm:$0xff]  }
 0x6ca   :  { %2559 = vmatprep.subr.bf16.mxu1 %v2828_v5  ;;  %v2873_v5 = vld [vmem:[#allocation7 + $0x128] sm:$0xff]  }
 0x6cd   :  { %2560 = vmatpush3.bf16.msra.mxu1 %v2829_v6 }
 0x6ce   :  { %2561 = vmatprep.subr.bf16.mxu1 %v2830_v7  ;;  %v2405_v7 = vld [vmem:[%s3258_s4 + $0x2] ss:$0 sm:$0xff] }
 0x6d1   :  { %2562 = vmatpush3.bf16.msra.mxu1 %v2831_v8 }
 0x6d2   :  { %2563 = vmatprep.subr.bf16.mxu1 %v2832_v9 }
 0x6d5   :  { %2564 = vmatpush3.bf16.msra.mxu1 %v2833_v10 }
 0x6d6   :  { %2565 = vmatprep.subr.bf16.mxu1 %v2834_v21  ;;  %v2876_v21 = vld [vmem:[#allocation7 + $0x178] sm:$0xff]  }
 0x6d9   :  { %2566 = vmatpush3.bf16.msra.mxu1 %v2835_v22  ;;  %v2877_v22 = vld [vmem:[#allocation7 + $0x138] sm:$0xff]  }
 0x6da   :  { %2567 = vmatprep.subr.bf16.mxu1 %v2836_v24  ;;  %v2878_v24 = vld [vmem:[#allocation9] sm:$0xff]  }
 0x6dd   :  { %2568 = vmatpush3.bf16.msra.mxu1 %v2837_v26  ;;  %v3031_v26 = vmov 0.0  }
 0x6de   :  { %2575 = vmatprep.subr.bf16.mxu1 %v2862_v57 }
 0x793   :  { %v2547_v11 = vpop.f32.mrb[12].mxu1 }
 0x794   :  { %v2548_v13 = vpop.f32.mrb[13].mxu1 }
 0x795   :  { %v2549_v14 = vadd.f32 %v2548_v13, %v2547_v11  ;;  %v2550_v15 = vpop.f32.mrb[14].mxu1 }
 0x796   :  { %v2551_v16 = vpop.f32.mrb[15].mxu1 }
 0x797   :  { %v1450_v17 = vadd.f32 %v2549_v14, %v2370_v12 }
 0x799   :  { %2896 = vtanh.f32 %v1450_v17 }
 0x7a3   :  { %v2897_v18 = vpop.eup %2896 }
 0x7a4   :  { %v3221_v19 = vadd.f32 %v2897_v18, %v3207_v23  ;;  %v1481_v23 = vrot.slane %v2387_v28, %v3166_v37  ;;  %v2874_v18 = vld [vmem:[#allocation7 + $0x170] sm:$0xff]   ;;  %v2879_v28 = vld [vmem:[#allocation9 + $0x8] sm:$0xff]  }
 0x7a6   :  { %v1474_v20 = vpack.c.bf16 %v3221_v19, %v3221_v19 }
 0x7a8   :  { %1601 = vmatmul.mubr.bf16.vlgmr.msra.gmra.mrb[16].mxu0 %v1474_v20  ;;  %v2875_v20 = vld [vmem:[#allocation7 + $0x130] sm:$0xff]  }
 0x7a9   :  { %1941 = vmatprep.mubr.bf16.mxu0 %v3030_v0  ;;  %1910 = vmatpush1.bf16.msra.mxu0 %v2838_v42  ;;  %v2883_v42 = vld [vmem:[#allocation9 + $0x28] sm:$0xff]  }
 0x7aa   :  { %1911 = vmatprep.subr.bf16.mxu0 %v2843_v43  ;;  %v2884_v43 = vld [vmem:[#allocation9 + $0x30] sm:$0xff]  }
 0x7ad   :  { %1912 = vmatpush1.bf16.msra.mxu0 %v2841_v44  ;;  %v2885_v44 = vld [vmem:[#allocation9 + $0x38] sm:$0xff]  }
 0x7ae   :  { %1913 = vmatprep.subr.bf16.mxu0 %v2846_v45 }
 0x7b1   :  { %1914 = vmatpush1.bf16.msra.mxu0 %v2844_v46  ;;  %v2440_v46 = vld [vmem:[%s3262_s8 + $0x2] ss:$0 sm:$0xff] }
 0x7b2   :  { %1915 = vmatprep.subr.bf16.mxu0 %v2849_v47 }
 0x7b5   :  { %1916 = vmatpush1.bf16.msra.mxu0 %v2847_v48 }
 0x7b6   :  { %1917 = vmatprep.subr.bf16.mxu0 %v2852_v49 }
 0x7b9   :  { %1918 = vmatpush1.bf16.msra.mxu0 %v2850_v50 }
 0x7ba   :  { %1919 = vmatprep.subr.bf16.mxu0 %v2855_v52 }
 0x7bd   :  { %1920 = vmatpush1.bf16.msra.mxu0 %v2853_v51 }
 0x7be   :  { %1921 = vmatprep.subr.bf16.mxu0 %v2858_v53 }
 0x7c1   :  { %1922 = vmatpush1.bf16.msra.mxu0 %v2856_v54  ;;  %v2904_v54 = vld [vmem:[%s3254_s0] sm:$0xff] }
 0x7c2   :  { %1923 = vmatprep.subr.bf16.mxu0 %v2861_v55 }
 0x7c5   :  { %1924 = vmatpush1.bf16.msra.mxu0 %v2859_v56 }
 0x7c6   :  { %2606 = vmatprep.subr.bf16.mxu0 %v3031_v26 }
 0x87b   :  { %v1602_v31 = vpop.f32.mrb[16].mxu0 }
 0x87c   :  { %v1603_v32 = vadd.f32 %v1602_v31, %v1481_v23  ;;  %v1604_v33 = vpop.f32.mrb[17].mxu0 }
 0x87d   :  { %v1605_v0 = vadd.f32 %v1604_v33, %v1485_v29  ;;  %v1606_v30 = vpop.f32.mrb[18].mxu0 }
 0x87e   :  { %vm1609_vm8 = vcmp.gt.f32.partialorder %v1603_v32, 0.0  ;;  %v1611_v25 = vmul.f32 0.01, %v1603_v32  ;;  %v1607_v34 = vpop.f32.mrb[19].mxu0 }
 0x87f   :  { %vm1610_vm9 = vcmp.gt.f32.partialorder %v1605_v0, 0.0  ;;  %v1612_v35 = vmul.f32 0.01, %v1605_v0 }
 0x880   :  { %v1613_v36 = vsel %vm1609_vm8, %v1603_v32, %v1611_v25 }
 0x881   :  { %v1614_v38 = vsel %vm1610_vm9, %v1605_v0, %v1612_v35  ;;  %v1648_v27 = vpack.c.bf16 %v1613_v36, %v1613_v36 }
 0x882   :  { %v1649_v40 = vpack.c.bf16 %v1614_v38, %v1614_v38 }
 0x884   :  { %1786 = vmatprep.mubr.bf16.mxu1 %v1649_v40 }
 0x885   :  { %1787 = vmatmul.mubr.bf16.vlgmr.msra.gmra.mrb[16].mxu1 %v1648_v27 }
 0x886   :  { %2576 = vmatpush3.bf16.msra.mxu1 %v2863_v58 }
 0x887   :  { %2577 = vmatprep.subr.bf16.mxu1 %v2864_v59 }
 0x88a   :  { %2578 = vmatpush3.bf16.msra.mxu1 %v2865_v60 }
 0x88b   :  { %2579 = vmatprep.subr.bf16.mxu1 %v2866_v61 }
 0x88e   :  { %2580 = vmatpush3.bf16.msra.mxu1 %v2867_v62 }
 0x88f   :  { %2581 = vmatprep.subr.bf16.mxu1 %v2868_v63 }
 0x892   :  { %2582 = vmatpush3.bf16.msra.mxu1 %v2869_v1 }
 0x893   :  { %2583 = vmatprep.subr.bf16.mxu1 %v2870_v2 }
 0x896   :  { %2584 = vmatpush3.bf16.msra.mxu1 %v2871_v3 }
 0x897   :  { %2585 = vmatprep.subr.bf16.mxu1 %v2872_v4 }
 0x89a   :  { %2586 = vmatpush3.bf16.msra.mxu1 %v2873_v5 }
 0x89b   :  { %2587 = vmatprep.subr.bf16.mxu1 %v2874_v18 }
 0x89e   :  { %2588 = vmatpush3.bf16.msra.mxu1 %v2875_v20 }
 0x89f   :  { %2589 = vmatprep.subr.bf16.mxu1 %v2876_v21 }
 0x8a2   :  { %2590 = vmatpush3.bf16.msra.mxu1 %v2877_v22 }
 0x958   :  { %v2569_v6 = vpop.f32.mrb[16].mxu1 }
 0x959   :  { %v2570_v8 = vpop.f32.mrb[17].mxu1 }
 0x95a   :  { %v2571_v9 = vadd.f32 %v2570_v8, %v2569_v6  ;;  %v2572_v10 = vpop.f32.mrb[18].mxu1 }
 0x95b   :  { %v2573_v11 = vpop.f32.mrb[19].mxu1 }
 0x95c   :  { %v1789_v12 = vadd.f32 %v2571_v9, %v2405_v7 }
 0x95e   :  { %2898 = vtanh.f32 %v1789_v12 }
 0x968   :  { %v2899_v13 = vpop.eup %2898 }
 0x969   :  { %v1795_v14 = vmul.f32 1.442695, %v2899_v13 }
 0x96b   :  { %2900 = vpow2.f32 %v1795_v14 }
 0x975   :  { %v2901_v15 = vpop.eup %2900 }
 0x976   :  { %v3235_v16 = vmul.f32 %v2901_v15, %v3221_v19  ;;  %v2422_v19 = vld [vmem:[%s3260_s6 + $0x4] sm:$0x3] }
 0x977   :  { %v1822_v23 = vrot.slane %v2422_v19, %v3166_v37  ;;  %v1826_v29 = vrot.slane %v2422_v19, %v3171_v39  ;;  %v2881_v37 = vld [vmem:[#allocation9 + $0x18] sm:$0xff]   ;;  %v2882_v39 = vld [vmem:[#allocation9 + $0x20] sm:$0xff]  }
 0x978   :  { %v1815_v17 = vpack.c.bf16 %v3235_v16, %v3235_v16 }
 0x97a   :  { %1942 = vmatmul.mubr.bf16.vlgmr.msra.gmra.mrb[20].mxu0 %v1815_v17 }
 0x97b   :  { %2607 = vmatpush3.bf16.msra.mxu0 %v2878_v24  ;;  %2622 = vmatprep.mubr.msk.bf16.mxu0 %vm3032_vm12, %v3031_v26 }
 0x97c   :  { %2608 = vmatprep.subr.bf16.mxu0 %v3031_v26 }
 0x97f   :  { %2609 = vmatpush3.bf16.msra.mxu0 %v2879_v28 }
 0x980   :  { %2610 = vmatprep.subr.bf16.mxu0 %v3031_v26 }
 0x983   :  { %2611 = vmatpush3.bf16.msra.mxu0 %v2880_v41 }
 0x984   :  { %2612 = vmatprep.subr.bf16.mxu0 %v3031_v26 }
 0x987   :  { %2613 = vmatpush3.bf16.msra.mxu0 %v2881_v37 }
 0x988   :  { %2614 = vmatprep.subr.bf16.mxu0 %v3031_v26 }
 0x98b   :  { %2615 = vmatpush3.bf16.msra.mxu0 %v2882_v39 }
 0x98c   :  { %2616 = vmatprep.subr.bf16.mxu0 %v3031_v26 }
 0x98f   :  { %2617 = vmatpush3.bf16.msra.mxu0 %v2883_v42 }
 0x990   :  { %2618 = vmatprep.subr.bf16.mxu0 %v3031_v26 }
 0x993   :  { %2619 = vmatpush3.bf16.msra.mxu0 %v2884_v43 }
 0x994   :  { %2620 = vmatprep.subr.bf16.mxu0 %v3031_v26 }
 0x997   :  { %2621 = vmatpush3.bf16.msra.mxu0 %v2885_v44 }
 0xa4d   :  { %v1943_v31 = vpop.f32.mrb[20].mxu0 }
 0xa4e   :  { %v1944_v32 = vadd.f32 %v1943_v31, %v1822_v23  ;;  %v1945_v33 = vpop.f32.mrb[21].mxu0 }
 0xa4f   :  { %v1946_v0 = vadd.f32 %v1945_v33, %v1826_v29  ;;  %v1947_v30 = vpop.f32.mrb[22].mxu0 }
 0xa50   :  { %vm1950_vm10 = vcmp.gt.f32.partialorder %v1944_v32, 0.0  ;;  %v1952_v25 = vmul.f32 0.01, %v1944_v32  ;;  %v1948_v34 = vpop.f32.mrb[23].mxu0 }
 0xa51   :  { %vm1951_vm11 = vcmp.gt.f32.partialorder %v1946_v0, 0.0  ;;  %v1953_v35 = vmul.f32 0.01, %v1946_v0 }
 0xa52   :  { %v1954_v36 = vsel %vm1950_vm10, %v1944_v32, %v1952_v25 }
 0xa53   :  { %v1955_v38 = vsel %vm1951_vm11, %v1946_v0, %v1953_v35  ;;  %v1989_v27 = vpack.c.bf16 %v1954_v36, %v1954_v36 }
 0xa54   :  { %v1990_v40 = vpack.c.bf16 %v1955_v38, %v1955_v38 }
 0xa56   :  { %2127 = vmatprep.mubr.bf16.mxu1 %v1990_v40 }
 0xa57   :  { %2128 = vmatmul.mubr.bf16.vlgmr.msra.gmra.mrb[20].mxu1 %v1989_v27 }
 0xb2a   :  { %v2591_v45 = vpop.f32.mrb[20].mxu1 }
 0xb2b   :  { %v2592_v47 = vpop.f32.mrb[21].mxu1 }
 0xb2c   :  { %v2593_v48 = vadd.f32 %v2592_v47, %v2591_v45  ;;  %v2594_v49 = vpop.f32.mrb[22].mxu1 }
 0xb2d   :  { %v2595_v50 = vpop.f32.mrb[23].mxu1 }
 0xb2e   :  { %v2130_v51 = vadd.f32 %v2593_v48, %v2440_v46 }
 0xb30   :  { %2902 = vtanh.f32 %v2130_v51 }
 0xb3a   :  { %v2903_v52 = vpop.eup %2902 }
 0xb3b   :  { %v2136_v53 = vadd.f32 %v2903_v52, %v3235_v16 }
 0xb3d   :  { %v2137_v55 = vadd.f32 %v2904_v54, %v2136_v53 }
 0xb3f   :  { %v2154_v56 = vpack.c.bf16 %v2137_v55, %v2137_v55 }
 0xb41   :  { %2623 = vmatmul.mubr.bf16.vlgmr.msra.gmra.mrb[24].mxu0 %v2154_v56 }
 0xc14   :  { %v2237_v57 = vpop.f32.mrb[24].mxu0 }
 0xc15   :  { %2243 = vst [vmem:[%s3264_s10] sm:$0xff] %v2237_v57  ;;  %v2624_v58 = vpop.f32.mrb[25].mxu0 }
 0xc16   :  { %v2240_v59 = vpop.f32.mrb[26].mxu0 }
 0xc17   :  { %v2625_v60 = vpop.f32.mrb[27].mxu0 }
 0xc18   :  { %2248 = vsyncpa [#allocation3], 1 }
 0xc19   :  { %2249 = vsyncpa [#allocation5], 1 }
 0xc1a   :  { %2250 = vsyncpa [#allocation8], 1 }

</bundles_post_ra>
